<compile_context>
chip_gen: v6e
topology: v6e:2x2x1
jax: 0.10.0
libtpu: 0.0.40
codegen_flags: <defaults>
</compile_context>

<pallas_src>
import math

import jax
import jax.numpy as jnp
from jax import lax
from jax.experimental import pallas as pl
from jax.experimental.pallas import tpu as pltpu


def _layernorm(h, g, b, eps=1e-5):
    mu = jnp.mean(h, axis=-1, keepdims=True)
    var = jnp.mean((h - mu) ** 2, axis=-1, keepdims=True)
    return (h - mu) * lax.rsqrt(var + eps) * g + b


def encoder_block_kernel(xq_ref, xkv_ref,
                         ln1_g_ref, ln1_b_ref,
                         wq_ref, bq_ref, wk_ref, bk_ref, wv_ref, bv_ref,
                         wo_ref, bo_ref,
                         ln2_g_ref, ln2_b_ref,
                         w1_ref, b1_ref, w2_ref, b2_ref,
                         o_ref):
    num_heads = wq_ref.shape[0]
    n_ff_chunks = w1_ref.shape[0]

    xq = xq_ref[0]                                   # (TQ, D) f32 -- query / residual rows
    tq, d = xq.shape

    # ---- block 1: pre-norm + multi-head self-attention + residual ----------
    xq_n = _layernorm(xq, ln1_g_ref[...], ln1_b_ref[...])
    if xkv_ref.shape[1] == xq_ref.shape[1]:
        # single query tile: the KV slab is the same block -> reuse the layernorm
        xkv_n = xq_n
    else:
        xkv_n = _layernorm(xkv_ref[0], ln1_g_ref[...], ln1_b_ref[...])

    xq_bf = xq_n.astype(jnp.bfloat16)
    xkv_bf = xkv_n.astype(jnp.bfloat16)

    # Per-head accumulation of the output projection: no concat, no (.,d_k) lane slices,
    # each head's intermediates die as soon as they are added to the accumulator.
    att = jnp.zeros((tq, d), jnp.float32)
    for h in range(num_heads):                       # static unroll (H is small and known)
        q_h = jnp.dot(xq_bf, wq_ref[h], preferred_element_type=jnp.float32) + bq_ref[h]
        k_h = jnp.dot(xkv_bf, wk_ref[h], preferred_element_type=jnp.float32) + bk_ref[h]
        v_h = jnp.dot(xkv_bf, wv_ref[h], preferred_element_type=jnp.float32) + bv_ref[h]
        # scores: contract d_k directly (trans_b form) -> no explicit XLU transpose
        s = lax.dot_general(q_h.astype(jnp.bfloat16), k_h.astype(jnp.bfloat16),
                            (((1,), (1,)), ((), ())),
                            preferred_element_type=jnp.float32)           # (TQ, T)
        m = jnp.max(s, axis=-1, keepdims=True)
        e = jnp.exp(s - m)
        p = e * pl.reciprocal(jnp.sum(e, axis=-1, keepdims=True), approx=True)
        o_h = jnp.dot(p.astype(jnp.bfloat16), v_h.astype(jnp.bfloat16),
                      preferred_element_type=jnp.float32)                 # (TQ, d_k)
        att = att + jnp.dot(o_h.astype(jnp.bfloat16), wo_ref[h],
                            preferred_element_type=jnp.float32)           # (TQ, D)
    att = att + bo_ref[...]
    x1 = xq + att

    # ---- block 2: pre-norm + position-wise feed-forward + residual ---------
    x2n_bf = _layernorm(x1, ln2_g_ref[...], ln2_b_ref[...]).astype(jnp.bfloat16)
    ff = jnp.zeros((tq, d), jnp.float32)
    for c in range(n_ff_chunks):                     # d_ff chunking: (TQ, d_ff) never materializes
        hmid = jnp.dot(x2n_bf, w1_ref[c], preferred_element_type=jnp.float32) + b1_ref[c]
        hmid = jnp.clip(hmid, 0.0, 6.0)              # relu6
        ff = ff + jnp.dot(hmid.astype(jnp.bfloat16), w2_ref[c],
                          preferred_element_type=jnp.float32)
    ff = ff + b2_ref[...]

    o_ref[0] = (x1 + ff).astype(o_ref.dtype)
    # TODO(synk): for very long T, replace the full (TQ, T) score matrix with an
    # online-softmax (flash-style) loop over KV tiles to bound VMEM on v7x.


def _pick_tile(total, target, align):
    """Largest chunk <= target that divides `total` and is `align`-aligned; else `total`."""
    if total <= target:
        return total
    start = (target // align) * align
    for t in range(start, align - 1, -align):
        if total % t == 0:
            return t
    return total


def transformer_encoder_block(x, params, num_heads, *, q_tile=256, ff_chunk=512):
    """x: (B, T, D) float32; params: dict of f32 weights (see init_params)."""
    B, T, D = x.shape
    assert D % num_heads == 0
    d_k = D // num_heads
    scale = 1.0 / math.sqrt(d_k)

    TQ = _pick_tile(T, q_tile, 8)            # query tile (multiple of 8 unless == T)
    n_q = T // TQ
    d_ff = params["w1"].shape[1]
    FFC = _pick_tile(d_ff, ff_chunk, 128)    # d_ff chunk (multiple of 128 unless == d_ff)
    n_ff = d_ff // FFC

    bf = jnp.bfloat16

    def split_heads_in(w):                   # (D, D) -> (H, D, d_k) per-head columns
        return w.reshape(D, num_heads, d_k).transpose(1, 0, 2)

    ordered = [
        params["ln1_g"], params["ln1_b"],
        # q projection: 1/sqrt(d_k) folded into weight + bias (free scaling)
        split_heads_in(params["wq"] * scale).astype(bf),
        (params["bq"] * scale).reshape(num_heads, 1, d_k),
        split_heads_in(params["wk"]).astype(bf),
        params["bk"].reshape(num_heads, 1, d_k),
        split_heads_in(params["wv"]).astype(bf),
        params["bv"].reshape(num_heads, 1, d_k),
        params["wo"].reshape(num_heads, d_k, D).astype(bf),                # per-head O-proj rows
        params["bo"],
        params["ln2_g"], params["ln2_b"],
        params["w1"].reshape(D, n_ff, FFC).transpose(1, 0, 2).astype(bf),  # (n_ff, D, FFC)
        params["b1"].reshape(n_ff, 1, FFC),
        params["w2"].reshape(n_ff, FFC, D).astype(bf),                     # (n_ff, FFC, D)
        params["b2"],
    ]

    # Weights are grid-invariant (constant index_map) and stay resident in VMEM.
    # TODO(synk): pipeline_mode=pl.Buffered(1) for weight specs would avoid double-buffering
    #             them; left at default pending verification in the MLIR dump.
    def resident_spec(p):
        nd = p.ndim
        return pl.BlockSpec(p.shape, lambda b, qi, _nd=nd: (0,) * _nd)

    in_specs = (
        [pl.BlockSpec((1, TQ, D), lambda b, qi: (b, qi, 0)),   # query / residual tile
         pl.BlockSpec((1, T, D), lambda b, qi: (b, 0, 0))]     # full-sequence slab for K/V
        + [resident_spec(p) for p in ordered]
    )
    out_specs = pl.BlockSpec((1, TQ, D), lambda b, qi: (b, qi, 0))

    return pl.pallas_call(
        encoder_block_kernel,
        out_shape=jax.ShapeDtypeStruct((B, T, D), jnp.float32),
        grid_spec=pltpu.PrefetchScalarGridSpec(
            num_scalar_prefetch=0,
            grid=(B, n_q),
            in_specs=in_specs,
            out_specs=out_specs,
        ),
        compiler_params=pltpu.CompilerParams(
            # batch x query-tile are independent -> both megacore-parallel (v7x: 2 TCs)
            dimension_semantics=("parallel", "parallel"),
            # raise scoped VMEM above the 16/32 MiB defaults; still <= v7x's 64 MiB physical
            vmem_limit_bytes=64 * 1024 * 1024,
        ),
    )(x, x, *ordered)


def init_params(key, D, d_ff):
    """Deterministic synthetic parameters (shapes match the nn.Module __init__), stored f32."""
    ks = jax.random.split(key, 8)
    s = 0.1
    return {
        # nn.LayerNorm(num_feats): gamma=1, beta=0
        "ln1_g": jnp.ones((1, D), jnp.float32), "ln1_b": jnp.zeros((1, D), jnp.float32),
        "ln2_g": jnp.ones((1, D), jnp.float32), "ln2_b": jnp.zeros((1, D), jnp.float32),
        # attention q/k/v/out projections (stored as (in, out); y = x @ W + b)
        "wq": s * jax.random.normal(ks[0], (D, D), jnp.float32), "bq": jnp.zeros((1, D), jnp.float32),
        "wk": s * jax.random.normal(ks[1], (D, D), jnp.float32), "bk": jnp.zeros((1, D), jnp.float32),
        "wv": s * jax.random.normal(ks[2], (D, D), jnp.float32), "bv": jnp.zeros((1, D), jnp.float32),
        "wo": s * jax.random.normal(ks[3], (D, D), jnp.float32), "bo": jnp.zeros((1, D), jnp.float32),
        # positionwise feed-forward: Linear(D, d_ff) -> relu6 -> Linear(d_ff, D)
        "w1": s * jax.random.normal(ks[4], (D, d_ff), jnp.float32), "b1": jnp.zeros((1, d_ff), jnp.float32),
        "w2": s * jax.random.normal(ks[5], (d_ff, D), jnp.float32), "b2": jnp.zeros((1, D), jnp.float32),
    }


def reference_forward(x, p, num_heads):
    """Pure-JAX f32 reference mirroring the PyTorch forward (norm_before=True, dropout=0)."""
    B, T, D = x.shape
    d_k = D // num_heads
    residual = x
    xn = _layernorm(x, p["ln1_g"], p["ln1_b"])
    q = xn @ p["wq"] + p["bq"]
    k = xn @ p["wk"] + p["bk"]
    v = xn @ p["wv"] + p["bv"]
    q = q.reshape(B, T, num_heads, d_k).transpose(0, 2, 1, 3)
    k = k.reshape(B, T, num_heads, d_k).transpose(0, 2, 1, 3)
    v = v.reshape(B, T, num_heads, d_k).transpose(0, 2, 1, 3)
    s = jnp.einsum("bhtd,bhsd->bhts", q, k) / math.sqrt(d_k)
    pmat = jax.nn.softmax(s, axis=-1)
    att = jnp.einsum("bhts,bhsd->bhtd", pmat, v).transpose(0, 2, 1, 3).reshape(B, T, D)
    att = att @ p["wo"] + p["bo"]
    x1 = residual + att
    residual = x1
    x2 = _layernorm(x1, p["ln2_g"], p["ln2_b"])
    h = jnp.clip(x2 @ p["w1"] + p["b1"], 0.0, 6.0)
    ff = h @ p["w2"] + p["b2"]
    return residual + ff


def _run_case(B, T, D, H, D_FF, seed, **kw):
    key = jax.random.PRNGKey(seed)
    kx, kp = jax.random.split(key)
    x = jax.random.normal(kx, (B, T, D), jnp.float32)
    params = init_params(kp, D, D_FF)
    out = jax.block_until_ready(transformer_encoder_block(x, params, H, **kw))
    ref = reference_forward(x, params, H)
    assert out.shape == (B, T, D)
    err = float(jnp.max(jnp.abs(out - ref)))
    # bf16 MXU inputs + approx reciprocal vs f32 reference -> loosened tolerance
    assert jnp.allclose(out, ref, atol=5e-2, rtol=5e-2), f"mismatch, max abs err={err}"


if __name__ == "__main__":
    # case 1: single query tile, single FFN chunk
    _run_case(B=2, T=8, D=32, H=4, D_FF=64, seed=0)
    # case 2: exercise multi-query-tile grid and d_ff chunking paths (still tiny)
    _run_case(B=2, T=16, D=32, H=4, D_FF=256, seed=0, q_tile=8, ff_chunk=128)

    # TODO(synk): dropout (rate>0), attention mask / local attention, relative positional
    # encodings, concat_after=True and the conv1d feed-forward variants are not exercised
    # in this default-path kernel.
    print("KERNEL_OK")
</pallas_src>

<mosaic_0001>
module attributes {stable_mosaic.version = 11 : i64} {
  func.func @encoder_block_kernel(%arg0: i32, %arg1: i32, %arg2: memref<1x8x32xf32, #tpu.memory_space<vmem>>, %arg3: memref<1x8x32xf32, #tpu.memory_space<vmem>>, %arg4: memref<1x32xf32, #tpu.memory_space<vmem>>, %arg5: memref<1x32xf32, #tpu.memory_space<vmem>>, %arg6: memref<4x32x8xbf16, #tpu.memory_space<vmem>>, %arg7: memref<4x1x8xf32, #tpu.memory_space<vmem>>, %arg8: memref<4x32x8xbf16, #tpu.memory_space<vmem>>, %arg9: memref<4x1x8xf32, #tpu.memory_space<vmem>>, %arg10: memref<4x32x8xbf16, #tpu.memory_space<vmem>>, %arg11: memref<4x1x8xf32, #tpu.memory_space<vmem>>, %arg12: memref<4x8x32xbf16, #tpu.memory_space<vmem>>, %arg13: memref<1x32xf32, #tpu.memory_space<vmem>>, %arg14: memref<1x32xf32, #tpu.memory_space<vmem>>, %arg15: memref<1x32xf32, #tpu.memory_space<vmem>>, %arg16: memref<1x32x64xbf16, #tpu.memory_space<vmem>>, %arg17: memref<1x1x64xf32, #tpu.memory_space<vmem>>, %arg18: memref<1x64x32xbf16, #tpu.memory_space<vmem>>, %arg19: memref<1x32xf32, #tpu.memory_space<vmem>>, %arg20: memref<1x8x32xf32, #tpu.memory_space<vmem>>) attributes {dimension_semantics = [#tpu.dimension_semantics<parallel>, #tpu.dimension_semantics<parallel>], iteration_bounds = array<i64: 2, 1>, scalar_prefetch = 0 : i64, scratch_operands = 0 : i64, tpu.core_type = #tpu.core_type<tc>, window_params = [{transform_indices = @transform_0, window_bounds = array<i64: 1, 8, 32>}, {transform_indices = @transform_1, window_bounds = array<i64: 1, 8, 32>}, {pipeline_mode = #tpu.pipeline_mode<synchronous>, transform_indices = @transform_2, window_bounds = array<i64: 1, 32>}, {pipeline_mode = #tpu.pipeline_mode<synchronous>, transform_indices = @transform_3, window_bounds = array<i64: 1, 32>}, {pipeline_mode = #tpu.pipeline_mode<synchronous>, transform_indices = @transform_4, window_bounds = array<i64: 4, 32, 8>}, {pipeline_mode = #tpu.pipeline_mode<synchronous>, transform_indices = @transform_5, window_bounds = array<i64: 4, 1, 8>}, {pipeline_mode = #tpu.pipeline_mode<synchronous>, transform_indices = @transform_6, window_bounds = array<i64: 4, 32, 8>}, {pipeline_mode = #tpu.pipeline_mode<synchronous>, transform_indices = @transform_7, window_bounds = array<i64: 4, 1, 8>}, {pipeline_mode = #tpu.pipeline_mode<synchronous>, transform_indices = @transform_8, window_bounds = array<i64: 4, 32, 8>}, {pipeline_mode = #tpu.pipeline_mode<synchronous>, transform_indices = @transform_9, window_bounds = array<i64: 4, 1, 8>}, {pipeline_mode = #tpu.pipeline_mode<synchronous>, transform_indices = @transform_10, window_bounds = array<i64: 4, 8, 32>}, {pipeline_mode = #tpu.pipeline_mode<synchronous>, transform_indices = @transform_11, window_bounds = array<i64: 1, 32>}, {pipeline_mode = #tpu.pipeline_mode<synchronous>, transform_indices = @transform_12, window_bounds = array<i64: 1, 32>}, {pipeline_mode = #tpu.pipeline_mode<synchronous>, transform_indices = @transform_13, window_bounds = array<i64: 1, 32>}, {pipeline_mode = #tpu.pipeline_mode<synchronous>, transform_indices = @transform_14, window_bounds = array<i64: 1, 32, 64>}, {pipeline_mode = #tpu.pipeline_mode<synchronous>, transform_indices = @transform_15, window_bounds = array<i64: 1, 1, 64>}, {pipeline_mode = #tpu.pipeline_mode<synchronous>, transform_indices = @transform_16, window_bounds = array<i64: 1, 64, 32>}, {pipeline_mode = #tpu.pipeline_mode<synchronous>, transform_indices = @transform_17, window_bounds = array<i64: 1, 32>}, {transform_indices = @transform_18, window_bounds = array<i64: 1, 8, 32>}]} {
    %c0 = arith.constant 0 : index
    %c0_0 = arith.constant 0 : index
    %c0_1 = arith.constant 0 : index
    %0 = vector.load %arg2[%c0, %c0_0, %c0_1] : memref<1x8x32xf32, #tpu.memory_space<vmem>>, vector<1x8x32xf32>
    %1 = vector.shape_cast %0 : vector<1x8x32xf32> to vector<8x32xf32>
    %c0_2 = arith.constant 0 : index
    %c0_3 = arith.constant 0 : index
    %2 = vector.load %arg4[%c0_2, %c0_3] : memref<1x32xf32, #tpu.memory_space<vmem>>, vector<1x32xf32>
    %c0_4 = arith.constant 0 : index
    %c0_5 = arith.constant 0 : index
    %3 = vector.load %arg5[%c0_4, %c0_5] : memref<1x32xf32, #tpu.memory_space<vmem>>, vector<1x32xf32>
    %cst = arith.constant dense<0.000000e+00> : vector<8xf32>
    %4 = vector.multi_reduction <add>, %1, %cst [1] : vector<8x32xf32> to vector<8xf32>
    %5 = vector.shape_cast %4 : vector<8xf32> to vector<8x1xf32>
    %cst_6 = arith.constant 3.200000e+01 : f32
    %6 = vector.broadcast %cst_6 : f32 to vector<8x1xf32>
    %7 = arith.divf %5, %6 : vector<8x1xf32>
    %8 = vector.broadcast %7 : vector<8x1xf32> to vector<8x32xf32>
    %9 = arith.subf %1, %8 : vector<8x32xf32>
    %10 = arith.mulf %9, %9 : vector<8x32xf32>
    %cst_7 = arith.constant dense<0.000000e+00> : vector<8xf32>
    %11 = vector.multi_reduction <add>, %10, %cst_7 [1] : vector<8x32xf32> to vector<8xf32>
    %12 = vector.shape_cast %11 : vector<8xf32> to vector<8x1xf32>
    %cst_8 = arith.constant 3.200000e+01 : f32
    %13 = vector.broadcast %cst_8 : f32 to vector<8x1xf32>
    %14 = arith.divf %12, %13 : vector<8x1xf32>
    %15 = vector.broadcast %7 : vector<8x1xf32> to vector<8x32xf32>
    %16 = arith.subf %1, %15 : vector<8x32xf32>
    %cst_9 = arith.constant 9.99999974E-6 : f32
    %17 = vector.broadcast %cst_9 : f32 to vector<8x1xf32>
    %18 = arith.addf %14, %17 : vector<8x1xf32>
    %19 = math.rsqrt %18 : vector<8x1xf32>
    %20 = vector.broadcast %19 : vector<8x1xf32> to vector<8x32xf32>
    %21 = arith.mulf %16, %20 : vector<8x32xf32>
    %22 = vector.broadcast %2 : vector<1x32xf32> to vector<8x32xf32>
    %23 = arith.mulf %21, %22 : vector<8x32xf32>
    %24 = vector.broadcast %3 : vector<1x32xf32> to vector<8x32xf32>
    %25 = arith.addf %23, %24 : vector<8x32xf32>
    %26 = arith.truncf %25 : vector<8x32xf32> to vector<8x32xbf16>
    %27 = arith.truncf %25 : vector<8x32xf32> to vector<8x32xbf16>
    %cst_10 = arith.constant 0.000000e+00 : f32
    %28 = vector.broadcast %cst_10 : f32 to vector<8x32xf32>
    %c0_11 = arith.constant 0 : index
    %c0_12 = arith.constant 0 : index
    %c0_13 = arith.constant 0 : index
    %29 = vector.load %arg6[%c0_11, %c0_12, %c0_13] : memref<4x32x8xbf16, #tpu.memory_space<vmem>>, vector<1x32x8xbf16>
    %30 = vector.shape_cast %29 : vector<1x32x8xbf16> to vector<32x8xbf16>
    %cst_14 = arith.constant dense<0.000000e+00> : vector<8x8xf32>
    %31 = tpu.matmul %26, %30, %cst_14 {dimension_numbers = #tpu.dot_dimension_numbers<[1], [0], [0], [1], [0, 0, 1, 1], [], []>} : vector<8x32xbf16>, vector<32x8xbf16>, vector<8x8xf32> -> vector<8x8xf32>
    %c0_15 = arith.constant 0 : index
    %c0_16 = arith.constant 0 : index
    %c0_17 = arith.constant 0 : index
    %32 = vector.load %arg7[%c0_15, %c0_16, %c0_17] : memref<4x1x8xf32, #tpu.memory_space<vmem>>, vector<1x1x8xf32>
    %33 = vector.shape_cast %32 : vector<1x1x8xf32> to vector<1x8xf32>
    %34 = vector.broadcast %33 : vector<1x8xf32> to vector<8x8xf32>
    %35 = arith.addf %31, %34 : vector<8x8xf32>
    %c0_18 = arith.constant 0 : index
    %c0_19 = arith.constant 0 : index
    %c0_20 = arith.constant 0 : index
    %36 = vector.load %arg8[%c0_18, %c0_19, %c0_20] : memref<4x32x8xbf16, #tpu.memory_space<vmem>>, vector<1x32x8xbf16>
    %37 = vector.shape_cast %36 : vector<1x32x8xbf16> to vector<32x8xbf16>
    %cst_21 = arith.constant dense<0.000000e+00> : vector<8x8xf32>
    %38 = tpu.matmul %27, %37, %cst_21 {dimension_numbers = #tpu.dot_dimension_numbers<[1], [0], [0], [1], [0, 0, 1, 1], [], []>} : vector<8x32xbf16>, vector<32x8xbf16>, vector<8x8xf32> -> vector<8x8xf32>
    %c0_22 = arith.constant 0 : index
    %c0_23 = arith.constant 0 : index
    %c0_24 = arith.constant 0 : index
    %39 = vector.load %arg9[%c0_22, %c0_23, %c0_24] : memref<4x1x8xf32, #tpu.memory_space<vmem>>, vector<1x1x8xf32>
    %40 = vector.shape_cast %39 : vector<1x1x8xf32> to vector<1x8xf32>
    %41 = vector.broadcast %40 : vector<1x8xf32> to vector<8x8xf32>
    %42 = arith.addf %38, %41 : vector<8x8xf32>
    %c0_25 = arith.constant 0 : index
    %c0_26 = arith.constant 0 : index
    %c0_27 = arith.constant 0 : index
    %43 = vector.load %arg10[%c0_25, %c0_26, %c0_27] : memref<4x32x8xbf16, #tpu.memory_space<vmem>>, vector<1x32x8xbf16>
    %44 = vector.shape_cast %43 : vector<1x32x8xbf16> to vector<32x8xbf16>
    %cst_28 = arith.constant dense<0.000000e+00> : vector<8x8xf32>
    %45 = tpu.matmul %27, %44, %cst_28 {dimension_numbers = #tpu.dot_dimension_numbers<[1], [0], [0], [1], [0, 0, 1, 1], [], []>} : vector<8x32xbf16>, vector<32x8xbf16>, vector<8x8xf32> -> vector<8x8xf32>
    %c0_29 = arith.constant 0 : index
    %c0_30 = arith.constant 0 : index
    %c0_31 = arith.constant 0 : index
    %46 = vector.load %arg11[%c0_29, %c0_30, %c0_31] : memref<4x1x8xf32, #tpu.memory_space<vmem>>, vector<1x1x8xf32>
    %47 = vector.shape_cast %46 : vector<1x1x8xf32> to vector<1x8xf32>
    %48 = vector.broadcast %47 : vector<1x8xf32> to vector<8x8xf32>
    %49 = arith.addf %45, %48 : vector<8x8xf32>
    %50 = arith.truncf %35 : vector<8x8xf32> to vector<8x8xbf16>
    %51 = arith.truncf %42 : vector<8x8xf32> to vector<8x8xbf16>
    %cst_32 = arith.constant dense<0.000000e+00> : vector<8x8xf32>
    %52 = tpu.matmul %50, %51, %cst_32 {dimension_numbers = #tpu.dot_dimension_numbers<[1], [1], [0], [0], [0, 0, 1, 0], [], []>} : vector<8x8xbf16>, vector<8x8xbf16>, vector<8x8xf32> -> vector<8x8xf32>
    %cst_33 = arith.constant dense<0xFF800000> : vector<8xf32>
    %53 = vector.multi_reduction <maximumf>, %52, %cst_33 [1] : vector<8x8xf32> to vector<8xf32>
    %54 = vector.shape_cast %53 : vector<8xf32> to vector<8x1xf32>
    %55 = vector.broadcast %54 : vector<8x1xf32> to vector<8x8xf32>
    %56 = arith.subf %52, %55 : vector<8x8xf32>
    %57 = math.exp %56 : vector<8x8xf32>
    %cst_34 = arith.constant dense<0.000000e+00> : vector<8xf32>
    %58 = vector.multi_reduction <add>, %57, %cst_34 [1] : vector<8x8xf32> to vector<8xf32>
    %59 = vector.shape_cast %58 : vector<8xf32> to vector<8x1xf32>
    %60 = tpu.reciprocal %59 {approx = true} : vector<8x1xf32> -> vector<8x1xf32>
    %61 = vector.broadcast %60 : vector<8x1xf32> to vector<8x8xf32>
    %62 = arith.mulf %57, %61 : vector<8x8xf32>
    %63 = arith.truncf %62 : vector<8x8xf32> to vector<8x8xbf16>
    %64 = arith.truncf %49 : vector<8x8xf32> to vector<8x8xbf16>
    %cst_35 = arith.constant dense<0.000000e+00> : vector<8x8xf32>
    %65 = tpu.matmul %63, %64, %cst_35 {dimension_numbers = #tpu.dot_dimension_numbers<[1], [0], [0], [1], [0, 0, 1, 1], [], []>} : vector<8x8xbf16>, vector<8x8xbf16>, vector<8x8xf32> -> vector<8x8xf32>
    %66 = arith.truncf %65 : vector<8x8xf32> to vector<8x8xbf16>
    %c0_36 = arith.constant 0 : index
    %c0_37 = arith.constant 0 : index
    %c0_38 = arith.constant 0 : index
    %67 = vector.load %arg12[%c0_36, %c0_37, %c0_38] : memref<4x8x32xbf16, #tpu.memory_space<vmem>>, vector<1x8x32xbf16>
    %68 = vector.shape_cast %67 : vector<1x8x32xbf16> to vector<8x32xbf16>
    %cst_39 = arith.constant dense<0.000000e+00> : vector<8x32xf32>
    %69 = tpu.matmul %66, %68, %cst_39 {dimension_numbers = #tpu.dot_dimension_numbers<[1], [0], [0], [1], [0, 0, 1, 1], [], []>} : vector<8x8xbf16>, vector<8x32xbf16>, vector<8x32xf32> -> vector<8x32xf32>
    %70 = arith.addf %28, %69 : vector<8x32xf32>
    %c1 = arith.constant 1 : index
    %c0_40 = arith.constant 0 : index
    %c0_41 = arith.constant 0 : index
    %71 = vector.load %arg6[%c1, %c0_40, %c0_41] : memref<4x32x8xbf16, #tpu.memory_space<vmem>>, vector<1x32x8xbf16>
    %72 = vector.shape_cast %71 : vector<1x32x8xbf16> to vector<32x8xbf16>
    %cst_42 = arith.constant dense<0.000000e+00> : vector<8x8xf32>
    %73 = tpu.matmul %26, %72, %cst_42 {dimension_numbers = #tpu.dot_dimension_numbers<[1], [0], [0], [1], [0, 0, 1, 1], [], []>} : vector<8x32xbf16>, vector<32x8xbf16>, vector<8x8xf32> -> vector<8x8xf32>
    %c1_43 = arith.constant 1 : index
    %c0_44 = arith.constant 0 : index
    %c0_45 = arith.constant 0 : index
    %74 = vector.load %arg7[%c1_43, %c0_44, %c0_45] : memref<4x1x8xf32, #tpu.memory_space<vmem>>, vector<1x1x8xf32>
    %75 = vector.shape_cast %74 : vector<1x1x8xf32> to vector<1x8xf32>
    %76 = vector.broadcast %75 : vector<1x8xf32> to vector<8x8xf32>
    %77 = arith.addf %73, %76 : vector<8x8xf32>
    %c1_46 = arith.constant 1 : index
    %c0_47 = arith.constant 0 : index
    %c0_48 = arith.constant 0 : index
    %78 = vector.load %arg8[%c1_46, %c0_47, %c0_48] : memref<4x32x8xbf16, #tpu.memory_space<vmem>>, vector<1x32x8xbf16>
    %79 = vector.shape_cast %78 : vector<1x32x8xbf16> to vector<32x8xbf16>
    %cst_49 = arith.constant dense<0.000000e+00> : vector<8x8xf32>
    %80 = tpu.matmul %27, %79, %cst_49 {dimension_numbers = #tpu.dot_dimension_numbers<[1], [0], [0], [1], [0, 0, 1, 1], [], []>} : vector<8x32xbf16>, vector<32x8xbf16>, vector<8x8xf32> -> vector<8x8xf32>
    %c1_50 = arith.constant 1 : index
    %c0_51 = arith.constant 0 : index
    %c0_52 = arith.constant 0 : index
    %81 = vector.load %arg9[%c1_50, %c0_51, %c0_52] : memref<4x1x8xf32, #tpu.memory_space<vmem>>, vector<1x1x8xf32>
    %82 = vector.shape_cast %81 : vector<1x1x8xf32> to vector<1x8xf32>
    %83 = vector.broadcast %82 : vector<1x8xf32> to vector<8x8xf32>
    %84 = arith.addf %80, %83 : vector<8x8xf32>
    %c1_53 = arith.constant 1 : index
    %c0_54 = arith.constant 0 : index
    %c0_55 = arith.constant 0 : index
    %85 = vector.load %arg10[%c1_53, %c0_54, %c0_55] : memref<4x32x8xbf16, #tpu.memory_space<vmem>>, vector<1x32x8xbf16>
    %86 = vector.shape_cast %85 : vector<1x32x8xbf16> to vector<32x8xbf16>
    %cst_56 = arith.constant dense<0.000000e+00> : vector<8x8xf32>
    %87 = tpu.matmul %27, %86, %cst_56 {dimension_numbers = #tpu.dot_dimension_numbers<[1], [0], [0], [1], [0, 0, 1, 1], [], []>} : vector<8x32xbf16>, vector<32x8xbf16>, vector<8x8xf32> -> vector<8x8xf32>
    %c1_57 = arith.constant 1 : index
    %c0_58 = arith.constant 0 : index
    %c0_59 = arith.constant 0 : index
    %88 = vector.load %arg11[%c1_57, %c0_58, %c0_59] : memref<4x1x8xf32, #tpu.memory_space<vmem>>, vector<1x1x8xf32>
    %89 = vector.shape_cast %88 : vector<1x1x8xf32> to vector<1x8xf32>
    %90 = vector.broadcast %89 : vector<1x8xf32> to vector<8x8xf32>
    %91 = arith.addf %87, %90 : vector<8x8xf32>
    %92 = arith.truncf %77 : vector<8x8xf32> to vector<8x8xbf16>
    %93 = arith.truncf %84 : vector<8x8xf32> to vector<8x8xbf16>
    %cst_60 = arith.constant dense<0.000000e+00> : vector<8x8xf32>
    %94 = tpu.matmul %92, %93, %cst_60 {dimension_numbers = #tpu.dot_dimension_numbers<[1], [1], [0], [0], [0, 0, 1, 0], [], []>} : vector<8x8xbf16>, vector<8x8xbf16>, vector<8x8xf32> -> vector<8x8xf32>
    %cst_61 = arith.constant dense<0xFF800000> : vector<8xf32>
    %95 = vector.multi_reduction <maximumf>, %94, %cst_61 [1] : vector<8x8xf32> to vector<8xf32>
    %96 = vector.shape_cast %95 : vector<8xf32> to vector<8x1xf32>
    %97 = vector.broadcast %96 : vector<8x1xf32> to vector<8x8xf32>
    %98 = arith.subf %94, %97 : vector<8x8xf32>
    %99 = math.exp %98 : vector<8x8xf32>
    %cst_62 = arith.constant dense<0.000000e+00> : vector<8xf32>
    %100 = vector.multi_reduction <add>, %99, %cst_62 [1] : vector<8x8xf32> to vector<8xf32>
    %101 = vector.shape_cast %100 : vector<8xf32> to vector<8x1xf32>
    %102 = tpu.reciprocal %101 {approx = true} : vector<8x1xf32> -> vector<8x1xf32>
    %103 = vector.broadcast %102 : vector<8x1xf32> to vector<8x8xf32>
    %104 = arith.mulf %99, %103 : vector<8x8xf32>
    %105 = arith.truncf %104 : vector<8x8xf32> to vector<8x8xbf16>
    %106 = arith.truncf %91 : vector<8x8xf32> to vector<8x8xbf16>
    %cst_63 = arith.constant dense<0.000000e+00> : vector<8x8xf32>
    %107 = tpu.matmul %105, %106, %cst_63 {dimension_numbers = #tpu.dot_dimension_numbers<[1], [0], [0], [1], [0, 0, 1, 1], [], []>} : vector<8x8xbf16>, vector<8x8xbf16>, vector<8x8xf32> -> vector<8x8xf32>
    %108 = arith.truncf %107 : vector<8x8xf32> to vector<8x8xbf16>
    %c1_64 = arith.constant 1 : index
    %c0_65 = arith.constant 0 : index
    %c0_66 = arith.constant 0 : index
    %109 = vector.load %arg12[%c1_64, %c0_65, %c0_66] : memref<4x8x32xbf16, #tpu.memory_space<vmem>>, vector<1x8x32xbf16>
    %110 = vector.shape_cast %109 : vector<1x8x32xbf16> to vector<8x32xbf16>
    %cst_67 = arith.constant dense<0.000000e+00> : vector<8x32xf32>
    %111 = tpu.matmul %108, %110, %cst_67 {dimension_numbers = #tpu.dot_dimension_numbers<[1], [0], [0], [1], [0, 0, 1, 1], [], []>} : vector<8x8xbf16>, vector<8x32xbf16>, vector<8x32xf32> -> vector<8x32xf32>
    %112 = arith.addf %70, %111 : vector<8x32xf32>
    %c2 = arith.constant 2 : index
    %c0_68 = arith.constant 0 : index
    %c0_69 = arith.constant 0 : index
    %113 = vector.load %arg6[%c2, %c0_68, %c0_69] : memref<4x32x8xbf16, #tpu.memory_space<vmem>>, vector<1x32x8xbf16>
    %114 = vector.shape_cast %113 : vector<1x32x8xbf16> to vector<32x8xbf16>
    %cst_70 = arith.constant dense<0.000000e+00> : vector<8x8xf32>
    %115 = tpu.matmul %26, %114, %cst_70 {dimension_numbers = #tpu.dot_dimension_numbers<[1], [0], [0], [1], [0, 0, 1, 1], [], []>} : vector<8x32xbf16>, vector<32x8xbf16>, vector<8x8xf32> -> vector<8x8xf32>
    %c2_71 = arith.constant 2 : index
    %c0_72 = arith.constant 0 : index
    %c0_73 = arith.constant 0 : index
    %116 = vector.load %arg7[%c2_71, %c0_72, %c0_73] : memref<4x1x8xf32, #tpu.memory_space<vmem>>, vector<1x1x8xf32>
    %117 = vector.shape_cast %116 : vector<1x1x8xf32> to vector<1x8xf32>
    %118 = vector.broadcast %117 : vector<1x8xf32> to vector<8x8xf32>
    %119 = arith.addf %115, %118 : vector<8x8xf32>
    %c2_74 = arith.constant 2 : index
    %c0_75 = arith.constant 0 : index
    %c0_76 = arith.constant 0 : index
    %120 = vector.load %arg8[%c2_74, %c0_75, %c0_76] : memref<4x32x8xbf16, #tpu.memory_space<vmem>>, vector<1x32x8xbf16>
    %121 = vector.shape_cast %120 : vector<1x32x8xbf16> to vector<32x8xbf16>
    %cst_77 = arith.constant dense<0.000000e+00> : vector<8x8xf32>
    %122 = tpu.matmul %27, %121, %cst_77 {dimension_numbers = #tpu.dot_dimension_numbers<[1], [0], [0], [1], [0, 0, 1, 1], [], []>} : vector<8x32xbf16>, vector<32x8xbf16>, vector<8x8xf32> -> vector<8x8xf32>
    %c2_78 = arith.constant 2 : index
    %c0_79 = arith.constant 0 : index
    %c0_80 = arith.constant 0 : index
    %123 = vector.load %arg9[%c2_78, %c0_79, %c0_80] : memref<4x1x8xf32, #tpu.memory_space<vmem>>, vector<1x1x8xf32>
    %124 = vector.shape_cast %123 : vector<1x1x8xf32> to vector<1x8xf32>
    %125 = vector.broadcast %124 : vector<1x8xf32> to vector<8x8xf32>
    %126 = arith.addf %122, %125 : vector<8x8xf32>
    %c2_81 = arith.constant 2 : index
    %c0_82 = arith.constant 0 : index
    %c0_83 = arith.constant 0 : index
    %127 = vector.load %arg10[%c2_81, %c0_82, %c0_83] : memref<4x32x8xbf16, #tpu.memory_space<vmem>>, vector<1x32x8xbf16>
    %128 = vector.shape_cast %127 : vector<1x32x8xbf16> to vector<32x8xbf16>
    %cst_84 = arith.constant dense<0.000000e+00> : vector<8x8xf32>
    %129 = tpu.matmul %27, %128, %cst_84 {dimension_numbers = #tpu.dot_dimension_numbers<[1], [0], [0], [1], [0, 0, 1, 1], [], []>} : vector<8x32xbf16>, vector<32x8xbf16>, vector<8x8xf32> -> vector<8x8xf32>
    %c2_85 = arith.constant 2 : index
    %c0_86 = arith.constant 0 : index
    %c0_87 = arith.constant 0 : index
    %130 = vector.load %arg11[%c2_85, %c0_86, %c0_87] : memref<4x1x8xf32, #tpu.memory_space<vmem>>, vector<1x1x8xf32>
    %131 = vector.shape_cast %130 : vector<1x1x8xf32> to vector<1x8xf32>
    %132 = vector.broadcast %131 : vector<1x8xf32> to vector<8x8xf32>
    %133 = arith.addf %129, %132 : vector<8x8xf32>
    %134 = arith.truncf %119 : vector<8x8xf32> to vector<8x8xbf16>
    %135 = arith.truncf %126 : vector<8x8xf32> to vector<8x8xbf16>
    %cst_88 = arith.constant dense<0.000000e+00> : vector<8x8xf32>
    %136 = tpu.matmul %134, %135, %cst_88 {dimension_numbers = #tpu.dot_dimension_numbers<[1], [1], [0], [0], [0, 0, 1, 0], [], []>} : vector<8x8xbf16>, vector<8x8xbf16>, vector<8x8xf32> -> vector<8x8xf32>
    %cst_89 = arith.constant dense<0xFF800000> : vector<8xf32>
    %137 = vector.multi_reduction <maximumf>, %136, %cst_89 [1] : vector<8x8xf32> to vector<8xf32>
    %138 = vector.shape_cast %137 : vector<8xf32> to vector<8x1xf32>
    %139 = vector.broadcast %138 : vector<8x1xf32> to vector<8x8xf32>
    %140 = arith.subf %136, %139 : vector<8x8xf32>
    %141 = math.exp %140 : vector<8x8xf32>
    %cst_90 = arith.constant dense<0.000000e+00> : vector<8xf32>
    %142 = vector.multi_reduction <add>, %141, %cst_90 [1] : vector<8x8xf32> to vector<8xf32>
    %143 = vector.shape_cast %142 : vector<8xf32> to vector<8x1xf32>
    %144 = tpu.reciprocal %143 {approx = true} : vector<8x1xf32> -> vector<8x1xf32>
    %145 = vector.broadcast %144 : vector<8x1xf32> to vector<8x8xf32>
    %146 = arith.mulf %141, %145 : vector<8x8xf32>
    %147 = arith.truncf %146 : vector<8x8xf32> to vector<8x8xbf16>
    %148 = arith.truncf %133 : vector<8x8xf32> to vector<8x8xbf16>
    %cst_91 = arith.constant dense<0.000000e+00> : vector<8x8xf32>
    %149 = tpu.matmul %147, %148, %cst_91 {dimension_numbers = #tpu.dot_dimension_numbers<[1], [0], [0], [1], [0, 0, 1, 1], [], []>} : vector<8x8xbf16>, vector<8x8xbf16>, vector<8x8xf32> -> vector<8x8xf32>
    %150 = arith.truncf %149 : vector<8x8xf32> to vector<8x8xbf16>
    %c2_92 = arith.constant 2 : index
    %c0_93 = arith.constant 0 : index
    %c0_94 = arith.constant 0 : index
    %151 = vector.load %arg12[%c2_92, %c0_93, %c0_94] : memref<4x8x32xbf16, #tpu.memory_space<vmem>>, vector<1x8x32xbf16>
    %152 = vector.shape_cast %151 : vector<1x8x32xbf16> to vector<8x32xbf16>
    %cst_95 = arith.constant dense<0.000000e+00> : vector<8x32xf32>
    %153 = tpu.matmul %150, %152, %cst_95 {dimension_numbers = #tpu.dot_dimension_numbers<[1], [0], [0], [1], [0, 0, 1, 1], [], []>} : vector<8x8xbf16>, vector<8x32xbf16>, vector<8x32xf32> -> vector<8x32xf32>
    %154 = arith.addf %112, %153 : vector<8x32xf32>
    %c3 = arith.constant 3 : index
    %c0_96 = arith.constant 0 : index
    %c0_97 = arith.constant 0 : index
    %155 = vector.load %arg6[%c3, %c0_96, %c0_97] : memref<4x32x8xbf16, #tpu.memory_space<vmem>>, vector<1x32x8xbf16>
    %156 = vector.shape_cast %155 : vector<1x32x8xbf16> to vector<32x8xbf16>
    %cst_98 = arith.constant dense<0.000000e+00> : vector<8x8xf32>
    %157 = tpu.matmul %26, %156, %cst_98 {dimension_numbers = #tpu.dot_dimension_numbers<[1], [0], [0], [1], [0, 0, 1, 1], [], []>} : vector<8x32xbf16>, vector<32x8xbf16>, vector<8x8xf32> -> vector<8x8xf32>
    %c3_99 = arith.constant 3 : index
    %c0_100 = arith.constant 0 : index
    %c0_101 = arith.constant 0 : index
    %158 = vector.load %arg7[%c3_99, %c0_100, %c0_101] : memref<4x1x8xf32, #tpu.memory_space<vmem>>, vector<1x1x8xf32>
    %159 = vector.shape_cast %158 : vector<1x1x8xf32> to vector<1x8xf32>
    %160 = vector.broadcast %159 : vector<1x8xf32> to vector<8x8xf32>
    %161 = arith.addf %157, %160 : vector<8x8xf32>
    %c3_102 = arith.constant 3 : index
    %c0_103 = arith.constant 0 : index
    %c0_104 = arith.constant 0 : index
    %162 = vector.load %arg8[%c3_102, %c0_103, %c0_104] : memref<4x32x8xbf16, #tpu.memory_space<vmem>>, vector<1x32x8xbf16>
    %163 = vector.shape_cast %162 : vector<1x32x8xbf16> to vector<32x8xbf16>
    %cst_105 = arith.constant dense<0.000000e+00> : vector<8x8xf32>
    %164 = tpu.matmul %27, %163, %cst_105 {dimension_numbers = #tpu.dot_dimension_numbers<[1], [0], [0], [1], [0, 0, 1, 1], [], []>} : vector<8x32xbf16>, vector<32x8xbf16>, vector<8x8xf32> -> vector<8x8xf32>
    %c3_106 = arith.constant 3 : index
    %c0_107 = arith.constant 0 : index
    %c0_108 = arith.constant 0 : index
    %165 = vector.load %arg9[%c3_106, %c0_107, %c0_108] : memref<4x1x8xf32, #tpu.memory_space<vmem>>, vector<1x1x8xf32>
    %166 = vector.shape_cast %165 : vector<1x1x8xf32> to vector<1x8xf32>
    %167 = vector.broadcast %166 : vector<1x8xf32> to vector<8x8xf32>
    %168 = arith.addf %164, %167 : vector<8x8xf32>
    %c3_109 = arith.constant 3 : index
    %c0_110 = arith.constant 0 : index
    %c0_111 = arith.constant 0 : index
    %169 = vector.load %arg10[%c3_109, %c0_110, %c0_111] : memref<4x32x8xbf16, #tpu.memory_space<vmem>>, vector<1x32x8xbf16>
    %170 = vector.shape_cast %169 : vector<1x32x8xbf16> to vector<32x8xbf16>
    %cst_112 = arith.constant dense<0.000000e+00> : vector<8x8xf32>
    %171 = tpu.matmul %27, %170, %cst_112 {dimension_numbers = #tpu.dot_dimension_numbers<[1], [0], [0], [1], [0, 0, 1, 1], [], []>} : vector<8x32xbf16>, vector<32x8xbf16>, vector<8x8xf32> -> vector<8x8xf32>
    %c3_113 = arith.constant 3 : index
    %c0_114 = arith.constant 0 : index
    %c0_115 = arith.constant 0 : index
    %172 = vector.load %arg11[%c3_113, %c0_114, %c0_115] : memref<4x1x8xf32, #tpu.memory_space<vmem>>, vector<1x1x8xf32>
    %173 = vector.shape_cast %172 : vector<1x1x8xf32> to vector<1x8xf32>
    %174 = vector.broadcast %173 : vector<1x8xf32> to vector<8x8xf32>
    %175 = arith.addf %171, %174 : vector<8x8xf32>
    %176 = arith.truncf %161 : vector<8x8xf32> to vector<8x8xbf16>
    %177 = arith.truncf %168 : vector<8x8xf32> to vector<8x8xbf16>
    %cst_116 = arith.constant dense<0.000000e+00> : vector<8x8xf32>
    %178 = tpu.matmul %176, %177, %cst_116 {dimension_numbers = #tpu.dot_dimension_numbers<[1], [1], [0], [0], [0, 0, 1, 0], [], []>} : vector<8x8xbf16>, vector<8x8xbf16>, vector<8x8xf32> -> vector<8x8xf32>
    %cst_117 = arith.constant dense<0xFF800000> : vector<8xf32>
    %179 = vector.multi_reduction <maximumf>, %178, %cst_117 [1] : vector<8x8xf32> to vector<8xf32>
    %180 = vector.shape_cast %179 : vector<8xf32> to vector<8x1xf32>
    %181 = vector.broadcast %180 : vector<8x1xf32> to vector<8x8xf32>
    %182 = arith.subf %178, %181 : vector<8x8xf32>
    %183 = math.exp %182 : vector<8x8xf32>
    %cst_118 = arith.constant dense<0.000000e+00> : vector<8xf32>
    %184 = vector.multi_reduction <add>, %183, %cst_118 [1] : vector<8x8xf32> to vector<8xf32>
    %185 = vector.shape_cast %184 : vector<8xf32> to vector<8x1xf32>
    %186 = tpu.reciprocal %185 {approx = true} : vector<8x1xf32> -> vector<8x1xf32>
    %187 = vector.broadcast %186 : vector<8x1xf32> to vector<8x8xf32>
    %188 = arith.mulf %183, %187 : vector<8x8xf32>
    %189 = arith.truncf %188 : vector<8x8xf32> to vector<8x8xbf16>
    %190 = arith.truncf %175 : vector<8x8xf32> to vector<8x8xbf16>
    %cst_119 = arith.constant dense<0.000000e+00> : vector<8x8xf32>
    %191 = tpu.matmul %189, %190, %cst_119 {dimension_numbers = #tpu.dot_dimension_numbers<[1], [0], [0], [1], [0, 0, 1, 1], [], []>} : vector<8x8xbf16>, vector<8x8xbf16>, vector<8x8xf32> -> vector<8x8xf32>
    %192 = arith.truncf %191 : vector<8x8xf32> to vector<8x8xbf16>
    %c3_120 = arith.constant 3 : index
    %c0_121 = arith.constant 0 : index
    %c0_122 = arith.constant 0 : index
    %193 = vector.load %arg12[%c3_120, %c0_121, %c0_122] : memref<4x8x32xbf16, #tpu.memory_space<vmem>>, vector<1x8x32xbf16>
    %194 = vector.shape_cast %193 : vector<1x8x32xbf16> to vector<8x32xbf16>
    %cst_123 = arith.constant dense<0.000000e+00> : vector<8x32xf32>
    %195 = tpu.matmul %192, %194, %cst_123 {dimension_numbers = #tpu.dot_dimension_numbers<[1], [0], [0], [1], [0, 0, 1, 1], [], []>} : vector<8x8xbf16>, vector<8x32xbf16>, vector<8x32xf32> -> vector<8x32xf32>
    %196 = arith.addf %154, %195 : vector<8x32xf32>
    %c0_124 = arith.constant 0 : index
    %c0_125 = arith.constant 0 : index
    %197 = vector.load %arg13[%c0_124, %c0_125] : memref<1x32xf32, #tpu.memory_space<vmem>>, vector<1x32xf32>
    %198 = vector.broadcast %197 : vector<1x32xf32> to vector<8x32xf32>
    %199 = arith.addf %196, %198 : vector<8x32xf32>
    %200 = arith.addf %1, %199 : vector<8x32xf32>
    %c0_126 = arith.constant 0 : index
    %c0_127 = arith.constant 0 : index
    %201 = vector.load %arg14[%c0_126, %c0_127] : memref<1x32xf32, #tpu.memory_space<vmem>>, vector<1x32xf32>
    %c0_128 = arith.constant 0 : index
    %c0_129 = arith.constant 0 : index
    %202 = vector.load %arg15[%c0_128, %c0_129] : memref<1x32xf32, #tpu.memory_space<vmem>>, vector<1x32xf32>
    %cst_130 = arith.constant dense<0.000000e+00> : vector<8xf32>
    %203 = vector.multi_reduction <add>, %200, %cst_130 [1] : vector<8x32xf32> to vector<8xf32>
    %204 = vector.shape_cast %203 : vector<8xf32> to vector<8x1xf32>
    %cst_131 = arith.constant 3.200000e+01 : f32
    %205 = vector.broadcast %cst_131 : f32 to vector<8x1xf32>
    %206 = arith.divf %204, %205 : vector<8x1xf32>
    %207 = vector.broadcast %206 : vector<8x1xf32> to vector<8x32xf32>
    %208 = arith.subf %200, %207 : vector<8x32xf32>
    %209 = arith.mulf %208, %208 : vector<8x32xf32>
    %cst_132 = arith.constant dense<0.000000e+00> : vector<8xf32>
    %210 = vector.multi_reduction <add>, %209, %cst_132 [1] : vector<8x32xf32> to vector<8xf32>
    %211 = vector.shape_cast %210 : vector<8xf32> to vector<8x1xf32>
    %cst_133 = arith.constant 3.200000e+01 : f32
    %212 = vector.broadcast %cst_133 : f32 to vector<8x1xf32>
    %213 = arith.divf %211, %212 : vector<8x1xf32>
    %214 = vector.broadcast %206 : vector<8x1xf32> to vector<8x32xf32>
    %215 = arith.subf %200, %214 : vector<8x32xf32>
    %cst_134 = arith.constant 9.99999974E-6 : f32
    %216 = vector.broadcast %cst_134 : f32 to vector<8x1xf32>
    %217 = arith.addf %213, %216 : vector<8x1xf32>
    %218 = math.rsqrt %217 : vector<8x1xf32>
    %219 = vector.broadcast %218 : vector<8x1xf32> to vector<8x32xf32>
    %220 = arith.mulf %215, %219 : vector<8x32xf32>
    %221 = vector.broadcast %201 : vector<1x32xf32> to vector<8x32xf32>
    %222 = arith.mulf %220, %221 : vector<8x32xf32>
    %223 = vector.broadcast %202 : vector<1x32xf32> to vector<8x32xf32>
    %224 = arith.addf %222, %223 : vector<8x32xf32>
    %225 = arith.truncf %224 : vector<8x32xf32> to vector<8x32xbf16>
    %cst_135 = arith.constant 0.000000e+00 : f32
    %226 = vector.broadcast %cst_135 : f32 to vector<8x32xf32>
    %c0_136 = arith.constant 0 : index
    %c0_137 = arith.constant 0 : index
    %c0_138 = arith.constant 0 : index
    %227 = vector.load %arg16[%c0_136, %c0_137, %c0_138] : memref<1x32x64xbf16, #tpu.memory_space<vmem>>, vector<1x32x64xbf16>
    %228 = vector.shape_cast %227 : vector<1x32x64xbf16> to vector<32x64xbf16>
    %cst_139 = arith.constant dense<0.000000e+00> : vector<8x64xf32>
    %229 = tpu.matmul %225, %228, %cst_139 {dimension_numbers = #tpu.dot_dimension_numbers<[1], [0], [0], [1], [0, 0, 1, 1], [], []>} : vector<8x32xbf16>, vector<32x64xbf16>, vector<8x64xf32> -> vector<8x64xf32>
    %c0_140 = arith.constant 0 : index
    %c0_141 = arith.constant 0 : index
    %c0_142 = arith.constant 0 : index
    %230 = vector.load %arg17[%c0_140, %c0_141, %c0_142] : memref<1x1x64xf32, #tpu.memory_space<vmem>>, vector<1x1x64xf32>
    %231 = vector.shape_cast %230 : vector<1x1x64xf32> to vector<1x64xf32>
    %232 = vector.broadcast %231 : vector<1x64xf32> to vector<8x64xf32>
    %233 = arith.addf %229, %232 : vector<8x64xf32>
    %cst_143 = arith.constant 0.000000e+00 : f32
    %cst_144 = arith.constant 6.000000e+00 : f32
    %234 = vector.broadcast %cst_143 : f32 to vector<8x64xf32>
    %235 = arith.maximumf %234, %233 : vector<8x64xf32>
    %236 = vector.broadcast %cst_144 : f32 to vector<8x64xf32>
    %237 = arith.minimumf %236, %235 : vector<8x64xf32>
    %238 = arith.truncf %237 : vector<8x64xf32> to vector<8x64xbf16>
    %c0_145 = arith.constant 0 : index
    %c0_146 = arith.constant 0 : index
    %c0_147 = arith.constant 0 : index
    %239 = vector.load %arg18[%c0_145, %c0_146, %c0_147] : memref<1x64x32xbf16, #tpu.memory_space<vmem>>, vector<1x64x32xbf16>
    %240 = vector.shape_cast %239 : vector<1x64x32xbf16> to vector<64x32xbf16>
    %cst_148 = arith.constant dense<0.000000e+00> : vector<8x32xf32>
    %241 = tpu.matmul %238, %240, %cst_148 {dimension_numbers = #tpu.dot_dimension_numbers<[1], [0], [0], [1], [0, 0, 1, 1], [], []>} : vector<8x64xbf16>, vector<64x32xbf16>, vector<8x32xf32> -> vector<8x32xf32>
    %242 = arith.addf %226, %241 : vector<8x32xf32>
    %c0_149 = arith.constant 0 : index
    %c0_150 = arith.constant 0 : index
    %243 = vector.load %arg19[%c0_149, %c0_150] : memref<1x32xf32, #tpu.memory_space<vmem>>, vector<1x32xf32>
    %244 = vector.broadcast %243 : vector<1x32xf32> to vector<8x32xf32>
    %245 = arith.addf %242, %244 : vector<8x32xf32>
    %246 = arith.addf %200, %245 : vector<8x32xf32>
    %c0_151 = arith.constant 0 : index
    %c0_152 = arith.constant 0 : index
    %c0_153 = arith.constant 0 : index
    %247 = vector.load %arg20[%c0_151, %c0_152, %c0_153] : memref<1x8x32xf32, #tpu.memory_space<vmem>>, vector<1x8x32xf32>
    %248 = vector.shape_cast %247 : vector<1x8x32xf32> to vector<8x32xf32>
    %249 = vector.shape_cast %246 : vector<8x32xf32> to vector<1x8x32xf32>
    tpu.vector_store %arg20[%c0_151, %c0_152, %c0_153], %249 {strides = array<i32>} : memref<1x8x32xf32, #tpu.memory_space<vmem>>, vector<1x8x32xf32>,
    return
  }
  func.func @transform_0(%arg0: i32, %arg1: i32) -> (i32, i32, i32) {
    %c0_i32 = arith.constant 0 : i32
    %c0_i32_0 = arith.constant 0 : i32
    return %arg0, %arg1, %c0_i32 : i32, i32, i32
  }
  func.func @transform_1(%arg0: i32, %arg1: i32) -> (i32, i32, i32) {
    %c0_i32 = arith.constant 0 : i32
    %c0_i32_0 = arith.constant 0 : i32
    %c0_i32_1 = arith.constant 0 : i32
    return %arg0, %c0_i32, %c0_i32_0 : i32, i32, i32
  }
  func.func @transform_2(%arg0: i32, %arg1: i32) -> (i32, i32) {
    %c0_i32 = arith.constant 0 : i32
    %c0_i32_0 = arith.constant 0 : i32
    %c0_i32_1 = arith.constant 0 : i32
    return %c0_i32, %c0_i32_0 : i32, i32
  }
  func.func @transform_3(%arg0: i32, %arg1: i32) -> (i32, i32) {
    %c0_i32 = arith.constant 0 : i32
    %c0_i32_0 = arith.constant 0 : i32
    %c0_i32_1 = arith.constant 0 : i32
    return %c0_i32, %c0_i32_0 : i32, i32
  }
  func.func @transform_4(%arg0: i32, %arg1: i32) -> (i32, i32, i32) {
    %c0_i32 = arith.constant 0 : i32
    %c0_i32_0 = arith.constant 0 : i32
    %c0_i32_1 = arith.constant 0 : i32
    %c0_i32_2 = arith.constant 0 : i32
    return %c0_i32, %c0_i32_0, %c0_i32_1 : i32, i32, i32
  }
  func.func @transform_5(%arg0: i32, %arg1: i32) -> (i32, i32, i32) {
    %c0_i32 = arith.constant 0 : i32
    %c0_i32_0 = arith.constant 0 : i32
    %c0_i32_1 = arith.constant 0 : i32
    %c0_i32_2 = arith.constant 0 : i32
    return %c0_i32, %c0_i32_0, %c0_i32_1 : i32, i32, i32
  }
  func.func @transform_6(%arg0: i32, %arg1: i32) -> (i32, i32, i32) {
    %c0_i32 = arith.constant 0 : i32
    %c0_i32_0 = arith.constant 0 : i32
    %c0_i32_1 = arith.constant 0 : i32
    %c0_i32_2 = arith.constant 0 : i32
    return %c0_i32, %c0_i32_0, %c0_i32_1 : i32, i32, i32
  }
  func.func @transform_7(%arg0: i32, %arg1: i32) -> (i32, i32, i32) {
    %c0_i32 = arith.constant 0 : i32
    %c0_i32_0 = arith.constant 0 : i32
    %c0_i32_1 = arith.constant 0 : i32
    %c0_i32_2 = arith.constant 0 : i32
    return %c0_i32, %c0_i32_0, %c0_i32_1 : i32, i32, i32
  }
  func.func @transform_8(%arg0: i32, %arg1: i32) -> (i32, i32, i32) {
    %c0_i32 = arith.constant 0 : i32
    %c0_i32_0 = arith.constant 0 : i32
    %c0_i32_1 = arith.constant 0 : i32
    %c0_i32_2 = arith.constant 0 : i32
    return %c0_i32, %c0_i32_0, %c0_i32_1 : i32, i32, i32
  }
  func.func @transform_9(%arg0: i32, %arg1: i32) -> (i32, i32, i32) {
    %c0_i32 = arith.constant 0 : i32
    %c0_i32_0 = arith.constant 0 : i32
    %c0_i32_1 = arith.constant 0 : i32
    %c0_i32_2 = arith.constant 0 : i32
    return %c0_i32, %c0_i32_0, %c0_i32_1 : i32, i32, i32
  }
  func.func @transform_10(%arg0: i32, %arg1: i32) -> (i32, i32, i32) {
    %c0_i32 = arith.constant 0 : i32
    %c0_i32_0 = arith.constant 0 : i32
    %c0_i32_1 = arith.constant 0 : i32
    %c0_i32_2 = arith.constant 0 : i32
    return %c0_i32, %c0_i32_0, %c0_i32_1 : i32, i32, i32
  }
  func.func @transform_11(%arg0: i32, %arg1: i32) -> (i32, i32) {
    %c0_i32 = arith.constant 0 : i32
    %c0_i32_0 = arith.constant 0 : i32
    %c0_i32_1 = arith.constant 0 : i32
    return %c0_i32, %c0_i32_0 : i32, i32
  }
  func.func @transform_12(%arg0: i32, %arg1: i32) -> (i32, i32) {
    %c0_i32 = arith.constant 0 : i32
    %c0_i32_0 = arith.constant 0 : i32
    %c0_i32_1 = arith.constant 0 : i32
    return %c0_i32, %c0_i32_0 : i32, i32
  }
  func.func @transform_13(%arg0: i32, %arg1: i32) -> (i32, i32) {
    %c0_i32 = arith.constant 0 : i32
    %c0_i32_0 = arith.constant 0 : i32
    %c0_i32_1 = arith.constant 0 : i32
    return %c0_i32, %c0_i32_0 : i32, i32
  }
  func.func @transform_14(%arg0: i32, %arg1: i32) -> (i32, i32, i32) {
    %c0_i32 = arith.constant 0 : i32
    %c0_i32_0 = arith.constant 0 : i32
    %c0_i32_1 = arith.constant 0 : i32
    %c0_i32_2 = arith.constant 0 : i32
    return %c0_i32, %c0_i32_0, %c0_i32_1 : i32, i32, i32
  }
  func.func @transform_15(%arg0: i32, %arg1: i32) -> (i32, i32, i32) {
    %c0_i32 = arith.constant 0 : i32
    %c0_i32_0 = arith.constant 0 : i32
    %c0_i32_1 = arith.constant 0 : i32
    %c0_i32_2 = arith.constant 0 : i32
    return %c0_i32, %c0_i32_0, %c0_i32_1 : i32, i32, i32
  }
  func.func @transform_16(%arg0: i32, %arg1: i32) -> (i32, i32, i32) {
    %c0_i32 = arith.constant 0 : i32
    %c0_i32_0 = arith.constant 0 : i32
    %c0_i32_1 = arith.constant 0 : i32
    %c0_i32_2 = arith.constant 0 : i32
    return %c0_i32, %c0_i32_0, %c0_i32_1 : i32, i32, i32
  }
  func.func @transform_17(%arg0: i32, %arg1: i32) -> (i32, i32) {
    %c0_i32 = arith.constant 0 : i32
    %c0_i32_0 = arith.constant 0 : i32
    %c0_i32_1 = arith.constant 0 : i32
    return %c0_i32, %c0_i32_0 : i32, i32
  }
  func.func @transform_18(%arg0: i32, %arg1: i32) -> (i32, i32, i32) {
    %c0_i32 = arith.constant 0 : i32
    %c0_i32_0 = arith.constant 0 : i32
    return %arg0, %arg1, %c0_i32 : i32, i32, i32
  }
}

</mosaic_0001>

<bundles_post_ra>
// kernel: tpu_custom_call.1
= control target key start
LH: loop header
LB: loop body
LE: loop exit
PB: predicated region body
PF: predicated region fallthrough
CT: control target
= control target key end

     0   :  { %s3454_s0 = inlined_call_operand.vmem [shape: f32[2,8,32], index: 0, kind: input, shape index: {}]   ;;  %s3455_s1 = inlined_call_operand.vmem [shape: f32[2,8,32], index: 1, kind: input, shape index: {}]   ;;  %s3456_s2 = inlined_call_operand.vmem [shape: f32[1,32], index: 2, kind: input, shape index: {}]   ;;  %s3457_s3 = inlined_call_operand.vmem [shape: f32[1,32], index: 3, kind: input, shape index: {}]   ;;  %s3458_s4 = inlined_call_operand.vmem [shape: bf16[4,32,8], index: 4, kind: input, shape index: {}]   ;;  %s3459_s5 = inlined_call_operand.vmem [shape: f32[4,1,8], index: 5, kind: input, shape index: {}]   ;;  %s3460_s6 = inlined_call_operand.vmem [shape: bf16[4,32,8], index: 6, kind: input, shape index: {}]   ;;  %s3461_s7 = inlined_call_operand.vmem [shape: f32[4,1,8], index: 7, kind: input, shape index: {}]   ;;  %s3462_s8 = inlined_call_operand.vmem [shape: bf16[4,32,8], index: 8, kind: input, shape index: {}]   ;;  %s3463_s9 = inlined_call_operand.vmem [shape: f32[4,1,8], index: 9, kind: input, shape index: {}]   ;;  %s3464_s10 = inlined_call_operand.vmem [shape: bf16[4,8,32], index: 10, kind: input, shape index: {}]   ;;  %s3465_s11 = inlined_call_operand.vmem [shape: f32[1,32], index: 11, kind: input, shape index: {}]   ;;  %s3466_s12 = inlined_call_operand.vmem [shape: f32[1,32], index: 12, kind: input, shape index: {}]   ;;  %s3467_s13 = inlined_call_operand.vmem [shape: f32[1,32], index: 13, kind: input, shape index: {}]   ;;  %s3468_s14 = inlined_call_operand.vmem [shape: bf16[1,32,64], index: 14, kind: input, shape index: {}]   ;;  %s3469_s15 = inlined_call_operand.vmem [shape: f32[1,1,64], index: 15, kind: input, shape index: {}]   ;;  %s3470_s16 = inlined_call_operand.vmem [shape: bf16[1,64,32], index: 16, kind: input, shape index: {}]   ;;  %s3471_s17 = inlined_call_operand.vmem [shape: f32[1,32], index: 17, kind: input, shape index: {}]   ;;  %s3472_s18 = inlined_call_operand.hbm [shape: f32[2,8,32], index: 18, kind: output, shape index: {}]  }
   0x1   :  { %3476 = sst [smem:[#allocation8_spill]] %s3454_s0 }
   0x2   :  { %3477 = sst [smem:[#allocation9_spill]] %s3456_s2 }
   0x3   :  { %3478 = sst [smem:[#allocation10_spill]] %s3457_s3 }
   0x4   :  { %3479 = sst [smem:[#allocation11_spill]] %s3458_s4 }
   0x5   :  { %3480 = sst [smem:[#allocation12_spill]] %s3459_s5 }
   0x6   :  { %23 = vsyncpa [#allocation3], 0 }
   0x7   :  { %25 = vsyncpa [#allocation3 + $0x1], 0  ;;  %s3015_s27 = smov 0   ;;  %s3017_s28 = smov 0  }
   0x8   :  { %s3019_s29 = smov 0   ;;  %s3021_s30 = smov 0  }
   0x9   :  { %s3023_s0 = smov 0   ;;  %s3025_s19 = smov 0  }
   0xa LB: > { %3481 = sst [smem:[#allocation5_spill]] %s2895_s27  ;;  %s2342_s20 = sadd.s32 4294967295, %s2915_s19   ;;  %s2915_s19 = sphi %s3025_s19, %s31_s19   ;;  %s2911_s0 = sphi %s3023_s0, %s3493_s0   ;;  %s2907_s30 = sphi %s3021_s30, %s3492_s30   ;;  %s2903_s29 = sphi %s3019_s29, %s3496_s29   ;;  %s2899_s28 = sphi %s3017_s28, %s3495_s28   ;;  %s2895_s27 = sphi %s3015_s27, %s3494_s27  }
   0xb   : > { %3482 = sst [smem:[#allocation6_spill]] %s2911_s0  ;;  %s2343_s1 = sadd.s32 4294967294, %s2915_s19  }
   0xc   : > { %s43_s21 = sadd.s32 1, %s2911_s0  ;;  %s442_s22 = sadd.s32 1, %s2903_s29 }
   0xd   : > { %p45_p0 = scmp.ge.s32.totalorder %s43_s21, 2  ;;  %p452_p1 = scmp.ne.s32.totalorder %s2903_s29, %s2899_s28 }
   0xe   : > { %p453_p2 = scmp.eq.s32.totalorder %s2342_s20, 1  ;;  %p458_p3 = scmp.ne.s32.totalorder %s2899_s28, %s2895_s27 }
   0xf   : > { %s3498_s21 = smov (%p45_p0, %s43_s21), 0  ;;  %p459_p5 = scmp.eq.s32.totalorder %s2343_s1, 1 }
  0x10   : > { %3483 = sst [smem:[#allocation7_spill]] %s3498_s21  ;;  %p3055_p4 = por %p453_p2, %p452_p1 }
  0x11   : > { %s437_s23 = ssub.s32 %s2911_s0, %s3498_s21  ;;  %p2346_p6 = scmp.ge.s32.totalorder %s2915_s19, 1 }
  0x12   : > { %p440_p7 = scmp.eq.s32.totalorder %s437_s23, 0  ;;  %p3062_p8 = por %p459_p5, %p458_p3 }
  0x13   : > { %p542_p9 = scmp.lt.s32.totalorder %s2915_s19, 3 }
  0x14   : > { %s3068_s25 = scalar_select %p440_p7, %s2903_s29, %s442_s22  }
  0x15   : > { %p543_p10 = pnand %p2346_p6, %p542_p9 }
  0x16   : > { %p602_p11 = scmp.lt.s32.totalorder (!%p543_p10), %s2907_s30, 1  ;;  %s3486_s21 = sld [smem:[#allocation8_spill]] (!%p543_p10) }
  0x17   : > { %546 = sbr.rel (%p543_p10) target bundleno = 4713 (0x1269), region = 92  ;;  %s3487_s4 = sld [smem:[#allocation11_spill]] (!%p543_p10) }
  0x18   : > { %s3488_s27 = sld [smem:[#allocation9_spill]] (!%p543_p10)  ;;  %s599_s23 = sand.u32 (!%p543_p10), 1, %s2899_s28  }
  0x19   : > { %s3489_s3 = sld [smem:[#allocation10_spill]] (!%p543_p10) }
  0x1a   : > { %s3490_s5 = sld [smem:[#allocation12_spill]] (!%p543_p10) }
  0x1c   : > { %s603_s26 = scalar_select %p602_p11, %s2907_s30, 1  ;;  %vm617_vm0 = vcmask 261120   ;;  %v2790_v8 = vld [vmem:[%s3460_s6 + $0x8] sm:$0xff]   ;;  %v2917_v9 = vmov 0.0   ;;  %v2792_v11 = vld [vmem:[%s3460_s6] sm:$0xff]   ;;  %vm2918_vm1 = vmmov 0  }
  0x1d   : > { %v2789_v7 = vld [vmem:[%s3487_s4 + $0x8] sm:$0xff]   ;;  %2544 = vmatprep.subr.bf16.mxu0 %v2917_v9  ;;  %2552 = vmatprep.subr.bf16.mxu1 %v2917_v9  ;;  %v2791_v10 = vld [vmem:[%s3487_s4] sm:$0xff]   ;;  %vm841_vm2 = vcmask 64512   ;;  %vm904_vm3 = vcmask 1043456   ;;  %v2795_v42 = vld [vmem:[%s3487_s4 + $0x18] sm:$0xff]   ;;  %vm2198_vm4 = vcmask 523264  }
  0x1e   : > { %s2348_s20 = sshll.u32 %s603_s26, 3  ;;  %2545 = vmatpush3.bf16.msra.mxu0 %v2789_v7  ;;  %2553 = vmatpush3.bf16.msra.mxu1 %v2790_v8  ;;  %v2349_v16 = vld [vmem:[%s3488_s27] ss:$0 sm:$0xff]  ;;  %v2793_v21 = vld [vmem:[%s3462_s8 + $0x8] sm:$0xff]   ;;  %v2796_v48 = vld [vmem:[%s3487_s4 + $0x10] sm:$0xff]   ;;  %s2347_s27 = sshll.u32 %s599_s23, 3 }
  0x1f   : > { %s608_s0 = scalar_lea.vmem %s3486_s21, %s2348_s20  ;;  %2546 = vmatprep.subr.bf16.mxu0 %v2917_v9  ;;  %2554 = vmatprep.subr.bf16.mxu1 %v2917_v9  ;;  %v2350_v18 = vld [vmem:[%s3489_s3] ss:$0 sm:$0xff]  ;;  %v2797_v49 = vld [vmem:[%s3462_s8 + $0x18] sm:$0xff]   ;;  %v2798_v50 = vld [vmem:[%s3462_s8 + $0x10] sm:$0xff]   ;;  %s2473_s26 = sshll.u32 %s2907_s30, 7 }
  0x20   : > { %v3075_v0 = vld [vmem:[%s608_s0] sm:$0xff]  ;;  %2548 = vmatprep.mubr.msk.bf16.mxu0 %vm2918_vm1, %v2917_v9  ;;  %2556 = vmatprep.mubr.msk.bf16.mxu1 %vm2918_vm1, %v2917_v9  ;;  %s601_s20 = scalar_lea.vmem [#allocation2], %s2347_s27  ;;  %s2245_s30 = scalar_lea.sflag [#allocation3], %s599_s23 }
  0x21   : > { %v618_v1 = vsel %vm617_vm0, %v3075_v0, 0.0  ;;  %v2794_v23 = vld [vmem:[%s3462_s8] sm:$0xff]   ;;  %s2259_s1 = sshll.u32 %s601_s20, 4  ;;  %s2919_s21 = smov [#allocation2]   ;;  %s3409_s1 = int_to_ptr.vmem [resolvable:$true] %s2259_s1 }
  0x22   : > { %619 = vadd.xlane.f32.xlu0 %v618_v1  ;;  %2547 = vmatpush3.bf16.msra.mxu0 %v2791_v10  ;;  %v2355_v24 = vld [vmem:[%s3461_s7] ss:$0 sm:$0xff]  ;;  %v2388_v60 = vld [vmem:[%s3463_s9 + $0x1] ss:$0 sm:$0xff]  ;;  %s2839_s27 = scalar_lea.vmem %s3409_s1, 128  ;;  %s2843_s0 = sshll.u32 %s2919_s21, 4  ;;  %s2844_s0 = int_to_ptr.vmem [resolvable:$false] %s2843_s0 }
  0x23   : > { %2555 = vmatpush3.bf16.msra.mxu1 %v2792_v11  ;;  %2560 = vmatprep.subr.bf16.mxu0 %v2917_v9  ;;  %v2351_v31 = vld [vmem:[%s3490_s5] ss:$0 sm:$0xff]  ;;  %p2840_p12 = scmp.ne.s32.totalorder %s3409_s1, %s2839_s27  ;;  %s2845_s3 = scalar_lea.vmem %s2844_s0, 256 }
  0x24   : > { %2568 = vmatprep.subr.bf16.mxu1 %v2917_v9  ;;  %v2359_v37 = vld [vmem:[%s3463_s9] ss:$0 sm:$0xff]  ;;  %p2846_p1 = scmp.lt.s32.totalorder %s3409_s1, %s2844_s0  ;;  %p2847_p2 = scmp.lt.s32.totalorder %s2845_s3, %s2839_s27 }
  0x25   : > { %p2841_p13 = pnand %p2840_p12, %p3055_p4 }
  0x26   : > { %p2848_p3 = por %p2847_p2, %p2846_p1 }
  0x27   : > { %p2842_p0 = pneg %p2841_p13 }
  0x29   : > { %p2849_p5 = pnand %p2848_p3, %p2842_p0 }
  0xab   : > { %v620_v2 = vpop.xlane.xlu0 %619 }
  0xac   : > { %v622_v3 = vmul.f32 0.03125, %v620_v2 }
  0xae   : > { %v623_v4 = vsub.f32 %v3075_v0, %v622_v3 }
  0xb0   : > { %v624_v5 = vmul.f32 %v623_v4, %v623_v4 }
  0xb2   : > { %v625_v6 = vsel %vm617_vm0, %v624_v5, 0.0 }
  0xb3   : > { %626 = vadd.xlane.f32.xlu0 %v625_v6 }
 0x13c   : > { %v627_v12 = vpop.xlane.xlu0 %626 }
 0x13d   : > { %v628_v13 = vmul.f32 0.03125, %v627_v12 }
 0x13f   : > { %v629_v14 = vadd.f32 1e-05, %v628_v13 }
 0x141   : > { %2819 = vrsqrt.f32 %v629_v14  ;;  %v2799_v14 = vld [vmem:[%s3460_s6 + $0x18] sm:$0xff]  }
 0x14e   : > { %v2820_v15 = vpop.eup %2819 }
 0x14f   : > { %v631_v17 = vmul.f32 %v2820_v15, %v623_v4 }
 0x151   : > { %v638_v19 = vmul.f32 %v2349_v16, %v631_v17  ;;  %v2800_v16 = vld [vmem:[%s3460_s6 + $0x10] sm:$0xff]  }
 0x153   : > { %v645_v20 = vadd.f32 %v2350_v18, %v638_v19 }
 0x155   : > { %v3112_v22 = vpack.c.bf16 %v645_v20, %v645_v20 }
 0x157   : > { %2549 = vmatmul.mubr.msk.bf16.vlgmr.msra.gmra.mxu0 %vm617_vm0, %v3112_v22  ;;  %2557 = vmatmul.mubr.msk.bf16.vlgmr.msra.gmra.mxu1 %vm617_vm0, %v3112_v22 }
 0x158   : > { %2561 = vmatpush3.bf16.msra.mxu0 %v2793_v21  ;;  %2564 = vmatprep.mubr.msk.bf16.mxu0 %vm2918_vm1, %v2917_v9  ;;  %v2379_v21 = vld [vmem:[%s3461_s7 + $0x1] ss:$0 sm:$0xff] }
 0x159   : > { %2562 = vmatprep.subr.bf16.mxu0 %v2917_v9  ;;  %2570 = vmatprep.mubr.msk.bf16.mxu1 %vm2918_vm1, %v2917_v9 }
 0x15c   : > { %2563 = vmatpush3.bf16.msra.mxu0 %v2794_v23 }
 0x15d   : > { %2574 = vmatprep.subr.bf16.mxu0 %v2917_v9 }
 0x15f   : > { %2565 = vmatmul.mubr.msk.bf16.vlgmr.msra.gmra.mxu0 %vm617_vm0, %v3112_v22 }
 0x160   : > { %2576 = vmatprep.mubr.msk.bf16.mxu0 %vm2918_vm1, %v2917_v9 }
 0x217   : > { %v707_v25 = vpop.f32.mrf.mxu0  ;;  %v770_v26 = vpop.f32.mrf.mxu1 }
 0x218   : > { %v771_v27 = vadd.f32 %v2355_v24, %v770_v26  ;;  %v708_v38 = vadd.f32 %v2351_v31, %v707_v25 }
 0x219   : > { %v2550_v28 = vpop.f32.mrf.mxu0  ;;  %v2558_v29 = vpop.f32.mrf.mxu1 }
 0x21a   : > { %v840_v30 = vpack.c.bf16 %v771_v27, %v771_v27  ;;  %v839_v43 = vpack.c.bf16 %v708_v38, %v708_v38  ;;  %v2370_v27 = vld [vmem:[%s3490_s5 + $0x1] ss:$0 sm:$0xff] }
 0x21b   : > { %v710_v32 = vpop.f32.mrf.mxu0  ;;  %v773_v33 = vpop.f32.mrf.mxu1 }
 0x21c   : > { %v846_v34 = vsel %vm841_vm2, %v840_v30, 0 }
 0x21d   : > { %v2551_v35 = vpop.f32.mrf.mxu0  ;;  %v2559_v36 = vpop.f32.mrf.mxu1  ;;  %2569 = vmatpush3.bf16.xpose.msra.mxu1 %v846_v34 }
 0x21e   : > { %2580 = vmatprep.subr.bf16.mxu1 %v2917_v9 }
 0x21f   : > { %v833_v39 = vpop.f32.mrf.mxu0 }
 0x220   : > { %v834_v40 = vadd.f32 %v2359_v37, %v833_v39 }
 0x221   : > { %v2566_v41 = vpop.f32.mrf.mxu0 }
 0x222   : > { %v900_v44 = vpack.c.bf16 %v834_v40, %v834_v40 }
 0x223   : > { %v836_v45 = vpop.f32.mrf.mxu0 }
 0x224   : > { %v906_v46 = vsel %vm904_vm3, %v900_v44, 0  ;;  %2571 = vmatmul.mubr.msk.bf16.vlgmr.msra.gmra.mxu1 %vm841_vm2, %v839_v43  ;;  %v2394_v43 = vld [vmem:[%s3464_s10 + $0x4] sm:$0xf] }
 0x225   : > { %v2567_v47 = vpop.f32.mrf.mxu0  ;;  %2575 = vmatpush3.bf16.msra.mxu0 %v906_v46  ;;  %2581 = vmatpush3.bf16.msra.mxu1 %v2795_v42  ;;  %v1259_v44 = vsel %vm904_vm3, %v2394_v43, 0  ;;  %v2426_v43 = vld [vmem:[%s3464_s10 + $0x8] sm:$0xf] }
 0x226   : > { %2582 = vmatprep.subr.bf16.mxu1 %v2917_v9  ;;  %2584 = vmatprep.mubr.msk.bf16.mxu1 %vm2918_vm1, %v2917_v9  ;;  %v949_v47 = vld [vmem:[%s3464_s10] sm:$0xf] }
 0x227   : > { %2588 = vmatprep.subr.bf16.mxu0 %v2917_v9 }
 0x229   : > { %2583 = vmatpush3.bf16.msra.mxu1 %v2796_v48 }
 0x22a   : > { %2596 = vmatprep.subr.bf16.mxu1 %v2917_v9 }
 0x22c   : > { %2585 = vmatmul.mubr.msk.bf16.vlgmr.msra.gmra.mxu1 %vm617_vm0, %v3112_v22 }
 0x22d   : > { %2597 = vmatpush3.bf16.msra.mxu1 %v2797_v49  ;;  %2600 = vmatprep.mubr.msk.bf16.mxu1 %vm2918_vm1, %v2917_v9 }
 0x22e   : > { %2598 = vmatprep.subr.bf16.mxu1 %v2917_v9 }
 0x231   : > { %2599 = vmatpush3.bf16.msra.mxu1 %v2798_v50  ;;  %v1305_v50 = vsel %vm904_vm3, %v949_v47, 0 }
 0x232   : > { %2610 = vmatprep.subr.bf16.mxu1 %v2917_v9 }
 0x234   : > { %2601 = vmatmul.mubr.msk.bf16.vlgmr.msra.gmra.mxu1 %vm617_vm0, %v3112_v22 }
 0x235   : > { %2612 = vmatprep.mubr.msk.bf16.mxu1 %vm2918_vm1, %v2917_v9 }
 0x2e4   : > { %v882_v51 = vpop.f32.mrf.mxu1 }
 0x2e5   : > { %v888_v52 = vsel %vm841_vm2, %v882_v51, -inf }
 0x2e6   : > { %889 = vmax.xlane.f32.xlu1 %v888_v52  ;;  %v2572_v53 = vpop.f32.mrf.mxu1 }
 0x2e7   : > { %v2802_v53 = vld [vmem:[%s3460_s6 + $0x20] sm:$0xff]  }
 0x2e8   : > { %v885_v54 = vpop.f32.mrf.mxu1 }
 0x2ea   : > { %v2573_v55 = vpop.f32.mrf.mxu1 }
 0x2eb   : > { %v2803_v55 = vld [vmem:[%s3487_s4 + $0x28] sm:$0xff]  }
 0x2ec   : > { %v1009_v56 = vpop.f32.mrf.mxu1 }
 0x2ed   : > { %v1010_v31 = vadd.f32 %v2370_v27, %v1009_v56 }
 0x2ee   : > { %v2586_v57 = vpop.f32.mrf.mxu1 }
 0x2ef   : > { %v1145_v32 = vpack.c.bf16 %v1010_v31, %v1010_v31 }
 0x2f0   : > { %v1012_v58 = vpop.f32.mrf.mxu1 }
 0x2f2   : > { %v2587_v59 = vpop.f32.mrf.mxu1 }
 0x2f3   : > { %v2804_v59 = vld [vmem:[%s3487_s4 + $0x20] sm:$0xff]  }
 0x2f4   : > { %v1139_v61 = vpop.f32.mrf.mxu1 }
 0x2f5   : > { %v1140_v62 = vadd.f32 %v2388_v60, %v1139_v61 }
 0x2f6   : > { %v2602_v63 = vpop.f32.mrf.mxu1 }
 0x2f7   : > { %v1205_v1 = vpack.c.bf16 %v1140_v62, %v1140_v62  ;;  %v2805_v62 = vld [vmem:[%s3462_s8 + $0x28] sm:$0xff]  }
 0x2f8   : > { %v1142_v2 = vpop.f32.mrf.mxu1 }
 0x2f9   : > { %v1210_v3 = vsel %vm904_vm3, %v1205_v1, 0  ;;  %v2806_v2 = vld [vmem:[%s3462_s8 + $0x20] sm:$0xff]  }
 0x2fa   : > { %v2603_v4 = vpop.f32.mrf.mxu1  ;;  %2611 = vmatpush3.bf16.msra.mxu1 %v1210_v3 }
 0x2fb   : > { %2622 = vmatprep.subr.bf16.mxu1 %v2917_v9  ;;  %v2411_v4 = vld [vmem:[%s3461_s7 + $0x2] ss:$0 sm:$0xff] }
 0x36f   : > { %v890_v5 = vpop.xlane.xlu1 %889 }
 0x370   : > { %v891_v6 = vsub.f32 %v882_v51, %v890_v5  ;;  %v2801_v51 = vld [vmem:[%s3460_s6 + $0x28] sm:$0xff]  }
 0x372   : > { %v892_v7 = vmul.f32 1.442695, %v891_v6 }
 0x374   : > { %2821 = vpow2.f32 %v892_v7 }
 0x381   : > { %v2822_v8 = vpop.eup %2821 }
 0x382   : > { %v894_v10 = vsel %vm841_vm2, %v2822_v8, 0.0 }
 0x383   : > { %895 = vadd.xlane.f32.xlu1 %v894_v10 }
 0x40c   : > { %v896_v11 = vpop.xlane.xlu1 %895 }
 0x40d   : > { %2823 = vrcp.f32 %v896_v11 }
 0x41a   : > { %v2824_v12 = vpop.eup %2823 }
 0x41b   : > { %v898_v13 = vmul.f32 %v2824_v12, %v2822_v8 }
 0x41d   : > { %v899_v15 = vpack.c.bf16 %v898_v13, %v898_v13 }
 0x41f   : > { %2577 = vmatmul.mubr.msk.bf16.vlgmr.msra.gmra.mxu0 %vm841_vm2, %v899_v15 }
 0x420   : > { %2589 = vmatpush3.bf16.msra.mxu0 %v2799_v14  ;;  %2592 = vmatprep.mubr.msk.bf16.mxu0 %vm2918_vm1, %v2917_v9 }
 0x421   : > { %2590 = vmatprep.subr.bf16.mxu0 %v2917_v9 }
 0x424   : > { %2591 = vmatpush3.bf16.msra.mxu0 %v2800_v16 }
 0x425   : > { %2604 = vmatprep.subr.bf16.mxu0 %v2917_v9 }
 0x427   : > { %2593 = vmatmul.mubr.msk.bf16.vlgmr.msra.gmra.mxu0 %vm617_vm0, %v3112_v22 }
 0x428   : > { %2606 = vmatprep.mubr.msk.bf16.mxu0 %vm2918_vm1, %v2917_v9 }
 0x4df   : > { %v942_v17 = vpop.f32.mrf.mxu0 }
 0x4e0   : > { %v948_v52 = vpack.c.bf16 %v942_v17, %v942_v17  ;;  %v2402_v17 = vld [vmem:[%s3490_s5 + $0x2] ss:$0 sm:$0xff] }
 0x4e1   : > { %v2578_v18 = vpop.f32.mrf.mxu0 }
 0x4e3   : > { %v945_v19 = vpop.f32.mrf.mxu0 }
 0x4e5   : > { %v2579_v20 = vpop.f32.mrf.mxu0 }
 0x4e7   : > { %v1074_v23 = vpop.f32.mrf.mxu0 }
 0x4e8   : > { %v1075_v24 = vadd.f32 %v2379_v21, %v1074_v23 }
 0x4e9   : > { %v2594_v25 = vpop.f32.mrf.mxu0 }
 0x4ea   : > { %v1146_v26 = vpack.c.bf16 %v1075_v24, %v1075_v24  ;;  %v2420_v25 = vld [vmem:[%s3463_s9 + $0x2] ss:$0 sm:$0xff] }
 0x4eb   : > { %v1077_v28 = vpop.f32.mrf.mxu0 }
 0x4ec   : > { %v1151_v29 = vsel %vm841_vm2, %v1146_v26, 0 }
 0x4ed   : > { %v2595_v30 = vpop.f32.mrf.mxu0  ;;  %2605 = vmatpush3.bf16.xpose.msra.mxu0 %v1151_v29 }
 0x4ee   : > { %2616 = vmatprep.subr.bf16.mxu0 %v2917_v9 }
 0x4f4   : > { %2607 = vmatmul.mubr.msk.bf16.vlgmr.msra.gmra.mxu0 %vm841_vm2, %v1145_v32 }
 0x4f5   : > { %2618 = vmatprep.mubr.msk.bf16.mxu0 %vm2918_vm1, %v2917_v9  ;;  %2617 = vmatpush3.bf16.msra.mxu0 %v1259_v44  ;;  %v1656_v44 = vsel %vm904_vm3, %v2426_v43, 0 }
 0x4f6   : > { %2628 = vmatprep.subr.bf16.mxu0 %v2917_v9 }
 0x5b4   : > { %v1187_v33 = vpop.f32.mrf.mxu0 }
 0x5b5   : > { %v1193_v34 = vsel %vm841_vm2, %v1187_v33, -inf }
 0x5b6   : > { %1194 = vmax.xlane.f32.xlu0 %v1193_v34  ;;  %v2608_v35 = vpop.f32.mrf.mxu0 }
 0x5b8   : > { %v1190_v36 = vpop.f32.mrf.mxu0 }
 0x5ba   : > { %v2609_v37 = vpop.f32.mrf.mxu0 }
 0x63f   : > { %v1195_v38 = vpop.xlane.xlu0 %1194 }
 0x640   : > { %v1196_v39 = vsub.f32 %v1187_v33, %v1195_v38 }
 0x642   : > { %v1197_v40 = vmul.f32 1.442695, %v1196_v39 }
 0x644   : > { %2825 = vpow2.f32 %v1197_v40 }
 0x651   : > { %v2826_v41 = vpop.eup %2825 }
 0x652   : > { %v1199_v42 = vsel %vm841_vm2, %v2826_v41, 0.0 }
 0x653   : > { %1200 = vadd.xlane.f32.xlu1 %v1199_v42 }
 0x6dc   : > { %v1201_v45 = vpop.xlane.xlu1 %1200 }
 0x6dd   : > { %2827 = vrcp.f32 %v1201_v45 }
 0x6ea   : > { %v2828_v46 = vpop.eup %2827 }
 0x6eb   : > { %v1203_v48 = vmul.f32 %v2828_v46, %v2826_v41 }
 0x6ed   : > { %v1204_v49 = vpack.c.bf16 %v1203_v48, %v1203_v48  ;;  %v2807_v48 = vld [vmem:[%s3487_s4 + $0x38] sm:$0xff]  }
 0x6ef   : > { %2613 = vmatmul.mubr.msk.bf16.vlgmr.msra.gmra.mxu1 %vm841_vm2, %v1204_v49 }
 0x6f0   : > { %2623 = vmatpush3.bf16.msra.mxu1 %v1305_v50  ;;  %2624 = vmatprep.mubr.msk.bf16.mxu1 %vm2918_vm1, %v2917_v9  ;;  %v2808_v50 = vld [vmem:[%s3487_s4 + $0x30] sm:$0xff]   ;;  %s3407_s4 = scalar_lea.hbm %s3472_s18, %s2473_s26 }
 0x6f1   : > { %2636 = vmatprep.subr.bf16.mxu1 %v2917_v9 }
 0x6f7   : > { %2625 = vmatmul.mubr.msk.bf16.vlgmr.msra.gmra.mxu1 %vm841_vm2, %v948_v52  ;;  %v2810_v52 = vld [vmem:[%s3462_s8 + $0x30] sm:$0xff]  }
 0x6f8   : > { %2637 = vmatpush3.bf16.msra.mxu1 %v2801_v51  ;;  %2640 = vmatprep.mubr.msk.bf16.mxu1 %vm2918_vm1, %v2917_v9  ;;  %v2809_v51 = vld [vmem:[%s3462_s8 + $0x38] sm:$0xff]  }
 0x6f9   : > { %2638 = vmatprep.subr.bf16.mxu1 %v2917_v9 }
 0x6fc   : > { %2639 = vmatpush3.bf16.msra.mxu1 %v2802_v53 }
 0x6fd   : > { %2652 = vmatprep.subr.bf16.mxu1 %v2917_v9 }
 0x6ff   : > { %2641 = vmatmul.mubr.msk.bf16.vlgmr.msra.gmra.mxu1 %vm617_vm0, %v3112_v22 }
 0x700   : > { %2654 = vmatprep.mubr.msk.bf16.mxu1 %vm2918_vm1, %v2917_v9 }
 0x7af   : > { %v1246_v54 = vpop.f32.mrf.mxu1 }
 0x7b0   : > { %v1252_v56 = vpack.c.bf16 %v1246_v54, %v1246_v54  ;;  %v2811_v54 = vld [vmem:[%s3460_s6 + $0x38] sm:$0xff]  }
 0x7b1   : > { %v2614_v57 = vpop.f32.mrf.mxu1 }
 0x7b2   : > { %2619 = vmatmul.mubr.msk.bf16.vlgmr.msra.gmra.mxu0 %vm841_vm2, %v1252_v56 }
 0x7b3   : > { %v1249_v58 = vpop.f32.mrf.mxu1  ;;  %2629 = vmatpush3.bf16.msra.mxu0 %v2803_v55  ;;  %2632 = vmatprep.mubr.msk.bf16.mxu0 %vm2918_vm1, %v2917_v9 }
 0x7b4   : > { %2630 = vmatprep.subr.bf16.mxu0 %v2917_v9  ;;  %v2812_v58 = vld [vmem:[%s3460_s6 + $0x30] sm:$0xff]  }
 0x7b5   : > { %v2615_v60 = vpop.f32.mrf.mxu1 }
 0x7b7   : > { %v3244_v61 = vpop.f32.mrf.mxu1  ;;  %2631 = vmatpush3.bf16.msra.mxu0 %v2804_v59 }
 0x7b8   : > { %2644 = vmatprep.subr.bf16.mxu0 %v2917_v9 }
 0x7b9   : > { %v2626_v63 = vpop.f32.mrf.mxu1 }
 0x7ba   : > { %2633 = vmatmul.mubr.msk.bf16.vlgmr.msra.gmra.mxu0 %vm617_vm0, %v3112_v22 }
 0x7bb   : > { %v1344_v1 = vpop.f32.mrf.mxu1  ;;  %2645 = vmatpush3.bf16.msra.mxu0 %v2805_v62  ;;  %2648 = vmatprep.mubr.msk.bf16.mxu0 %vm2918_vm1, %v2917_v9 }
 0x7bc   : > { %2646 = vmatprep.subr.bf16.mxu0 %v2917_v9 }
 0x7bd   : > { %v2627_v3 = vpop.f32.mrf.mxu1 }
 0x7bf   : > { %v1471_v5 = vpop.f32.mrf.mxu1  ;;  %2647 = vmatpush3.bf16.msra.mxu0 %v2806_v2  ;;  %v2451_v2 = vld [vmem:[%s3463_s9 + $0x3] ss:$0 sm:$0xff] }
 0x7c0   : > { %v1472_v6 = vadd.f32 %v2411_v4, %v1471_v5  ;;  %2658 = vmatprep.subr.bf16.mxu0 %v2917_v9 }
 0x7c1   : > { %v2642_v7 = vpop.f32.mrf.mxu1 }
 0x7c2   : > { %v1543_v8 = vpack.c.bf16 %v1472_v6, %v1472_v6  ;;  %2649 = vmatmul.mubr.msk.bf16.vlgmr.msra.gmra.mxu0 %vm617_vm0, %v3112_v22 }
 0x7c3   : > { %v1474_v10 = vpop.f32.mrf.mxu1  ;;  %2660 = vmatprep.mubr.msk.bf16.mxu0 %vm2918_vm1, %v2917_v9 }
 0x7c4   : > { %v1548_v11 = vsel %vm841_vm2, %v1543_v8, 0 }
 0x7c5   : > { %v2643_v12 = vpop.f32.mrf.mxu1  ;;  %2653 = vmatpush3.bf16.xpose.msra.mxu1 %v1548_v11 }
 0x7c6   : > { %2664 = vmatprep.subr.bf16.mxu1 %v2917_v9 }
 0x872   : > { %v3268_v13 = vpop.f32.mrf.mxu0 }
 0x874   : > { %v2620_v14 = vpop.f32.mrf.mxu0 }
 0x876   : > { %v1298_v15 = vpop.f32.mrf.mxu0 }
 0x878   : > { %v2621_v16 = vpop.f32.mrf.mxu0 }
 0x87a   : > { %v1406_v18 = vpop.f32.mrf.mxu0 }
 0x87b   : > { %v1407_v19 = vadd.f32 %v2402_v17, %v1406_v18  ;;  %v2442_v17 = vld [vmem:[%s3461_s7 + $0x3] ss:$0 sm:$0xff] }
 0x87c   : > { %v2634_v20 = vpop.f32.mrf.mxu0 }
 0x87d   : > { %v1542_v21 = vpack.c.bf16 %v1407_v19, %v1407_v19 }
 0x87e   : > { %v1409_v23 = vpop.f32.mrf.mxu0 }
 0x87f   : > { %2655 = vmatmul.mubr.msk.bf16.vlgmr.msra.gmra.mxu1 %vm841_vm2, %v1542_v21  ;;  %v2433_v23 = vld [vmem:[%s3490_s5 + $0x3] ss:$0 sm:$0xff] }
 0x880   : > { %v2635_v24 = vpop.f32.mrf.mxu0  ;;  %2666 = vmatprep.mubr.msk.bf16.mxu1 %vm2918_vm1, %v2917_v9  ;;  %2665 = vmatpush3.bf16.msra.mxu1 %v1656_v44 }
 0x881   : > { %2678 = vmatprep.subr.bf16.mxu1 %v2917_v9 }
 0x882   : > { %v1536_v26 = vpop.f32.mrf.mxu0 }
 0x883   : > { %v1537_v27 = vadd.f32 %v2420_v25, %v1536_v26 }
 0x884   : > { %v2650_v28 = vpop.f32.mrf.mxu0 }
 0x885   : > { %v1602_v29 = vpack.c.bf16 %v1537_v27, %v1537_v27 }
 0x886   : > { %v1539_v30 = vpop.f32.mrf.mxu0 }
 0x887   : > { %v1607_v31 = vsel %vm904_vm3, %v1602_v29, 0 }
 0x888   : > { %v2651_v32 = vpop.f32.mrf.mxu0  ;;  %2659 = vmatpush3.bf16.msra.mxu0 %v1607_v31 }
 0x889   : > { %2670 = vmatprep.subr.bf16.mxu0 %v2917_v9 }
 0x93f   : > { %v1584_v33 = vpop.f32.mrf.mxu1 }
 0x940   : > { %v1590_v34 = vsel %vm841_vm2, %v1584_v33, -inf }
 0x941   : > { %1591 = vmax.xlane.f32.xlu0 %v1590_v34  ;;  %v2656_v35 = vpop.f32.mrf.mxu1 }
 0x943   : > { %v1587_v36 = vpop.f32.mrf.mxu1 }
 0x945   : > { %v2657_v37 = vpop.f32.mrf.mxu1 }
 0x946   : > { %v2457_v37 = vld [vmem:[%s3464_s10 + $0xc] sm:$0xf] }
 0x9ca   : > { %v1592_v38 = vpop.xlane.xlu0 %1591 }
 0x9cb   : > { %v1593_v39 = vsub.f32 %v1584_v33, %v1592_v38  ;;  %v2008_v38 = vsel %vm904_vm3, %v2457_v37, 0 }
 0x9cd   : > { %v1594_v40 = vmul.f32 1.442695, %v1593_v39 }
 0x9cf   : > { %2829 = vpow2.f32 %v1594_v40 }
 0x9dc   : > { %v2830_v41 = vpop.eup %2829 }
 0x9dd   : > { %v1596_v42 = vsel %vm841_vm2, %v2830_v41, 0.0 }
 0x9de   : > { %1597 = vadd.xlane.f32.xlu1 %v1596_v42 }
 0xa67   : > { %v1598_v45 = vpop.xlane.xlu1 %1597 }
 0xa68   : > { %2831 = vrcp.f32 %v1598_v45 }
 0xa75   : > { %v2832_v46 = vpop.eup %2831 }
 0xa76   : > { %v1600_v47 = vmul.f32 %v2832_v46, %v2830_v41 }
 0xa78   : > { %v1601_v49 = vpack.c.bf16 %v1600_v47, %v1600_v47 }
 0xa7a   : > { %2661 = vmatmul.mubr.msk.bf16.vlgmr.msra.gmra.mxu0 %vm841_vm2, %v1601_v49  ;;  %v2459_v49 = vld [vmem:[%s3465_s11] ss:$0 sm:$0xff] }
 0xa7b   : > { %2671 = vmatpush3.bf16.msra.mxu0 %v2807_v48  ;;  %2674 = vmatprep.mubr.msk.bf16.mxu0 %vm2918_vm1, %v2917_v9 }
 0xa7c   : > { %2672 = vmatprep.subr.bf16.mxu0 %v2917_v9 }
 0xa7f   : > { %2673 = vmatpush3.bf16.msra.mxu0 %v2808_v50 }
 0xa80   : > { %2686 = vmatprep.subr.bf16.mxu0 %v2917_v9 }
 0xa82   : > { %2675 = vmatmul.mubr.msk.bf16.vlgmr.msra.gmra.mxu0 %vm617_vm0, %v3112_v22 }
 0xa83   : > { %2687 = vmatpush3.bf16.msra.mxu0 %v2809_v51  ;;  %2690 = vmatprep.mubr.msk.bf16.mxu0 %vm2918_vm1, %v2917_v9 }
 0xa84   : > { %2688 = vmatprep.subr.bf16.mxu0 %v2917_v9 }
 0xa87   : > { %2689 = vmatpush3.bf16.msra.mxu0 %v2810_v52 }
 0xa88   : > { %2700 = vmatprep.subr.bf16.mxu0 %v2917_v9 }
 0xa8a   : > { %2691 = vmatmul.mubr.msk.bf16.vlgmr.msra.gmra.mxu0 %vm617_vm0, %v3112_v22 }
 0xa8b   : > { %2702 = vmatprep.mubr.msk.bf16.mxu0 %vm2918_vm1, %v2917_v9 }
 0xb3a   : > { %v1643_v53 = vpop.f32.mrf.mxu0 }
 0xb3b   : > { %v1649_v55 = vpack.c.bf16 %v1643_v53, %v1643_v53 }
 0xb3c   : > { %v2662_v56 = vpop.f32.mrf.mxu0 }
 0xb3d   : > { %2667 = vmatmul.mubr.msk.bf16.vlgmr.msra.gmra.mxu1 %vm841_vm2, %v1649_v55 }
 0xb3e   : > { %v1646_v57 = vpop.f32.mrf.mxu0  ;;  %2679 = vmatpush3.bf16.msra.mxu1 %v2811_v54  ;;  %2682 = vmatprep.mubr.msk.bf16.mxu1 %vm2918_vm1, %v2917_v9 }
 0xb3f   : > { %2680 = vmatprep.subr.bf16.mxu1 %v2917_v9 }
 0xb40   : > { %v2663_v59 = vpop.f32.mrf.mxu0 }
 0xb42   : > { %v1758_v60 = vpop.f32.mrf.mxu0  ;;  %2681 = vmatpush3.bf16.msra.mxu1 %v2812_v58 }
 0xb43   : > { %2694 = vmatprep.subr.bf16.mxu1 %v2917_v9  ;;  %v1759_v25 = vadd.f32 %v2433_v23, %v1758_v60 }
 0xb44   : > { %v2676_v62 = vpop.f32.mrf.mxu0 }
 0xb45   : > { %2683 = vmatmul.mubr.msk.bf16.vlgmr.msra.gmra.mxu1 %vm617_vm0, %v3112_v22  ;;  %v1342_v22 = vadd.f32 %v3244_v61, %v3268_v13  ;;  %v1894_v26 = vpack.c.bf16 %v1759_v25, %v1759_v25 }
 0xb46   : > { %v1761_v63 = vpop.f32.mrf.mxu0  ;;  %2696 = vmatprep.mubr.msk.bf16.mxu1 %vm2918_vm1, %v2917_v9 }
 0xb47   : > { %v2813_v63 = vld [vmem:[%s3468_s14 + $0x8] sm:$0xff]  }
 0xb48   : > { %v2677_v1 = vpop.f32.mrf.mxu0 }
 0xb49   : > { %v2815_v1 = vld [vmem:[%s3470_s16 + $0x18] sm:$0xff]  }
 0xb4a   : > { %v1888_v3 = vpop.f32.mrf.mxu0 }
 0xb4b   : > { %v1889_v4 = vadd.f32 %v2451_v2, %v1888_v3  ;;  %v2816_v2 = vld [vmem:[%s3470_s16 + $0x10] sm:$0xff]  }
 0xb4c   : > { %v2692_v5 = vpop.f32.mrf.mxu0 }
 0xb4d   : > { %v1954_v6 = vpack.c.bf16 %v1889_v4, %v1889_v4 }
 0xb4e   : > { %v1891_v7 = vpop.f32.mrf.mxu0 }
 0xb4f   : > { %v1959_v8 = vsel %vm904_vm3, %v1954_v6, 0  ;;  %v2460_v7 = vld [vmem:[%s3466_s12] ss:$0 sm:$0xff] }
 0xb50   : > { %v2693_v10 = vpop.f32.mrf.mxu0  ;;  %2701 = vmatpush3.bf16.msra.mxu0 %v1959_v8 }
 0xb51   : > { %2712 = vmatprep.subr.bf16.mxu0 %v2917_v9  ;;  %v2461_v10 = vld [vmem:[%s3467_s13] ss:$0 sm:$0xff] }
 0xbfd   : > { %v1692_v11 = vpop.f32.mrf.mxu1 }
 0xbfe   : > { %v1698_v12 = vadd.f32 %v1692_v11, %v1342_v22 }
 0xbff   : > { %v2668_v14 = vpop.f32.mrf.mxu1 }
 0xc00   : > { %v2817_v14 = vld [vmem:[%s3470_s16 + $0x8] sm:$0xff]  }
 0xc01   : > { %v1695_v15 = vpop.f32.mrf.mxu1 }
 0xc02   : > { %v2818_v15 = vld [vmem:[%s3470_s16] sm:$0xff]  }
 0xc03   : > { %v2669_v16 = vpop.f32.mrf.mxu1 }
 0xc04   : > { %v2462_v16 = vld [vmem:[%s3469_s15] ss:$0 sm:$0xff] }
 0xc05   : > { %v1823_v18 = vpop.f32.mrf.mxu1 }
 0xc06   : > { %v1824_v19 = vadd.f32 %v2442_v17, %v1823_v18 }
 0xc07   : > { %v2684_v20 = vpop.f32.mrf.mxu1 }
 0xc08   : > { %v1895_v21 = vpack.c.bf16 %v1824_v19, %v1824_v19 }
 0xc09   : > { %v1826_v24 = vpop.f32.mrf.mxu1 }
 0xc0a   : > { %v1900_v61 = vsel %vm841_vm2, %v1895_v21, 0 }
 0xc0b   : > { %v2685_v13 = vpop.f32.mrf.mxu1  ;;  %2695 = vmatpush3.bf16.xpose.msra.mxu1 %v1900_v61 }
 0xc0c   : > { %2706 = vmatprep.subr.bf16.mxu1 %v2917_v9 }
 0xc12   : > { %2697 = vmatmul.mubr.msk.bf16.vlgmr.msra.gmra.mxu1 %vm841_vm2, %v1894_v26 }
 0xc13   : > { %2708 = vmatprep.mubr.msk.bf16.mxu1 %vm2918_vm1, %v2917_v9  ;;  %2707 = vmatpush3.bf16.msra.mxu1 %v2008_v38 }
 0xc14   : > { %2720 = vmatprep.subr.bf16.mxu1 %v2917_v9 }
 0xcd2   : > { %v1936_v27 = vpop.f32.mrf.mxu1 }
 0xcd3   : > { %v1942_v28 = vsel %vm841_vm2, %v1936_v27, -inf }
 0xcd4   : > { %1943 = vmax.xlane.f32.xlu0 %v1942_v28  ;;  %v2698_v29 = vpop.f32.mrf.mxu1 }
 0xcd6   : > { %v1939_v30 = vpop.f32.mrf.mxu1 }
 0xcd8   : > { %v2699_v31 = vpop.f32.mrf.mxu1 }
 0xd5d   : > { %v1944_v32 = vpop.xlane.xlu0 %1943 }
 0xd5e   : > { %v1945_v33 = vsub.f32 %v1936_v27, %v1944_v32 }
 0xd60   : > { %v1946_v34 = vmul.f32 1.442695, %v1945_v33 }
 0xd62   : > { %2833 = vpow2.f32 %v1946_v34 }
 0xd6f   : > { %v2834_v35 = vpop.eup %2833 }
 0xd70   : > { %v1948_v36 = vsel %vm841_vm2, %v2834_v35, 0.0 }
 0xd71   : > { %1949 = vadd.xlane.f32.xlu1 %v1948_v36 }
 0xdfa   : > { %v1950_v39 = vpop.xlane.xlu1 %1949 }
 0xdfb   : > { %2835 = vrcp.f32 %v1950_v39 }
 0xe08   : > { %v2836_v40 = vpop.eup %2835 }
 0xe09   : > { %v1952_v41 = vmul.f32 %v2836_v40, %v2834_v35 }
 0xe0b   : > { %v1953_v42 = vpack.c.bf16 %v1952_v41, %v1952_v41 }
 0xe0d   : > { %2703 = vmatmul.mubr.msk.bf16.vlgmr.msra.gmra.mxu0 %vm841_vm2, %v1953_v42 }
 0xe0e   : > { %2716 = vmatprep.mubr.msk.bf16.mxu0 %vm2918_vm1, %v2917_v9  ;;  %2713 = vmatpush3.bf16.msra.mxu0 %v2813_v63 }
 0xe0f   : > { %2714 = vmatprep.subr.bf16.mxu0 %v2917_v9 }
 0xecd   : > { %v1995_v43 = vpop.f32.mrf.mxu0 }
 0xece   : > { %v2001_v44 = vpack.c.bf16 %v1995_v43, %v1995_v43 }
 0xecf   : > { %v2704_v45 = vpop.f32.mrf.mxu0 }
 0xed0   : > { %2709 = vmatmul.mubr.msk.bf16.vlgmr.msra.gmra.mxu1 %vm841_vm2, %v2001_v44 }
 0xed1   : > { %v1998_v46 = vpop.f32.mrf.mxu0  ;;  %2728 = vmatprep.mubr.msk.bf16.mxu1 %vm2918_vm1, %v2917_v9  ;;  %2721 = vmatpush3.bf16.msra.mxu1 %v2815_v1 }
 0xed2   : > { %2722 = vmatprep.subr.bf16.mxu1 %v2917_v9 }
 0xed3   : > { %v2705_v47 = vpop.f32.mrf.mxu0 }
 0xed5   : > { %2723 = vmatpush3.bf16.msra.mxu1 %v2816_v2 }
 0xed6   : > { %2724 = vmatprep.subr.bf16.mxu1 %v2917_v9 }
 0xed9   : > { %2725 = vmatpush3.bf16.msra.mxu1 %v2817_v14 }
 0xeda   : > { %2726 = vmatprep.subr.bf16.mxu1 %v2917_v9  ;;  %v2466_v9 = vld [vmem:[%s3471_s17] ss:$0 sm:$0xff] }
 0xedd   : > { %2727 = vmatpush3.bf16.msra.mxu1 %v2818_v15 }
 0xf90   : > { %v2044_v48 = vpop.f32.mrf.mxu1 }
 0xf91   : > { %v2050_v50 = vadd.f32 %v2044_v48, %v1698_v12 }
 0xf92   : > { %v2710_v51 = vpop.f32.mrf.mxu1 }
 0xf93   : > { %v2058_v52 = vadd.f32 %v2459_v49, %v2050_v50 }
 0xf94   : > { %v2047_v53 = vpop.f32.mrf.mxu1 }
 0xf95   : > { %v2059_v54 = vadd.f32 %v2058_v52, %v3075_v0  ;;  %v2814_v0 = vld [vmem:[%s3468_s14] sm:$0xff]  }
 0xf96   : > { %v2711_v55 = vpop.f32.mrf.mxu1  ;;  %2715 = vmatpush3.bf16.msra.mxu0 %v2814_v0 }
 0xf97   : > { %v2062_v56 = vsel %vm617_vm0, %v2059_v54, 0.0 }
 0xf98   : > { %2063 = vadd.xlane.f32.xlu0 %v2062_v56 }
0x1021   : > { %v2064_v57 = vpop.xlane.xlu0 %2063 }
0x1022   : > { %v2065_v58 = vmul.f32 0.03125, %v2064_v57 }
0x1024   : > { %v2066_v59 = vsub.f32 %v2059_v54, %v2065_v58 }
0x1026   : > { %v2067_v60 = vmul.f32 %v2066_v59, %v2066_v59 }
0x1028   : > { %v2068_v62 = vsel %vm617_vm0, %v2067_v60, 0.0 }
0x1029   : > { %2069 = vadd.xlane.f32.xlu1 %v2068_v62 }
0x10b2   : > { %v2070_v3 = vpop.xlane.xlu1 %2069 }
0x10b3   : > { %v2071_v4 = vmul.f32 0.03125, %v2070_v3 }
0x10b5   : > { %v2072_v5 = vadd.f32 1e-05, %v2071_v4 }
0x10b7   : > { %2837 = vrsqrt.f32 %v2072_v5 }
0x10c4   : > { %v2838_v6 = vpop.eup %2837 }
0x10c5   : > { %v2074_v8 = vmul.f32 %v2838_v6, %v2066_v59 }
0x10c7   : > { %v2081_v22 = vmul.f32 %v2460_v7, %v2074_v8 }
0x10c9   : > { %v2088_v11 = vadd.f32 %v2461_v10, %v2081_v22 }
0x10cb   : > { %v2089_v12 = vpack.c.bf16 %v2088_v11, %v2088_v11 }
0x10cd   : > { %2717 = vmatmul.mubr.msk.bf16.vlgmr.msra.gmra.mxu0 %vm617_vm0, %v2089_v12 }
0x118d   : > { %v2150_v17 = vpop.f32.mrf.mxu0 }
0x118e   : > { %v2151_v18 = vadd.f32 %v2462_v16, %v2150_v17 }
0x118f   : > { %v2718_v19 = vpop.f32.mrf.mxu0 }
0x1190   : > { %v2156_v20 = vmax.f32 %v2151_v18, 0.0 }
0x1191   : > { %v2153_v21 = vpop.f32.mrf.mxu0 }
0x1192   : > { %v2157_v23 = vmin.f32 %v2156_v20, 6.0 }
0x1193   : > { %v2719_v24 = vpop.f32.mrf.mxu0 }
0x1194   : > { %v2158_v61 = vpack.c.bf16 %v2157_v23, %v2157_v23 }
0x1196   : > { %2729 = vmatmul.mubr.msk.bf16.vlgmr.msra.gmra.mxu1 %vm2198_vm4, %v2158_v61 }
0x1256   : > { %v2236_v13 = vpop.f32.mrf.mxu1 }
0x1257   : > { %v2237_v25 = vadd.f32 %v2466_v9, %v2236_v13 }
0x1258   : > { %v2730_v26 = vpop.f32.mrf.mxu1 }
0x1259   : > { %v2242_v27 = vadd.f32 %v2237_v25, %v2059_v54 }
0x125a   : > { %v2239_v28 = vpop.f32.mrf.mxu1 }
0x125b   : > { %2243 = vst.msk [vmem:[%s601_s20] sm:$0xff] %vm617_vm0, %v2242_v27 }
0x125c   : > { %v2731_v29 = vpop.f32.mrf.mxu1 }
0x125d   : > { %2852 = shalt.err (!%p2849_p5)
}
0x125e   : > { %s2853_s26 = scalar_lea.hbm %s3407_s4, 128  ;;  %s2857_s22 = scalar_lea.hbm %s3472_s18, 256 }
0x125f   : > { %p2854_p6 = scmp.ne.s32.totalorder %s3407_s4, %s2853_s26  ;;  %p2858_p10 = scmp.lt.s32.totalorder %s3407_s4, %s3472_s18 }
0x1260   : > { %p2859_p11 = scmp.lt.s32.totalorder %s2857_s22, %s2853_s26 }
0x1261   : > { %p2855_p7 = pnand %p2854_p6, %p3055_p4 }
0x1262   : > { %p2860_p12 = por %p2859_p11, %p2858_p10 }
0x1263   : > { %p2856_p9 = pneg %p2855_p7 }
0x1265   : > { %p2861_p13 = pnand %p2860_p12, %p2856_p9 }
0x1267   : > { %2864 = shalt.err (!%p2861_p13)
}
0x1268   : > { %2732 = dma.vmem_to_hbm [thread:$0]  (%p3055_p4), %s3409_s1, 128, %s3407_s4, %s2245_s30  }
0x1269 PF: > { %s3491_s27 = sld [smem:[#allocation5_spill]]  ;;  %p2738_p0 = scmp.ge.s32.totalorder %s2915_s19, 2 }
0x126b   : > { %p2735_p1 = pnand %p2738_p0, %p3062_p8 }
0x126d   : > { %p2736_p2 = pneg %p2735_p1 }
0x126f   : > { %s2271_s0 = sand.u32 1, %s3491_s27  }
0x1270   : > { %s2272_s5 = scalar_lea.sflag [#allocation3], %s2271_s0 }
0x1271   : > { %2890 = dma.done.wait (%p2736_p2), %s2272_s5, 128  }
0x1272   : > { %2892 = vsyncadd (%p2736_p2), %s2272_s5, 4294967168  ;;  %s31_s19 = sadd.s32 1, %s2915_s19   ;;  %s3492_s30 = sld [smem:[#allocation6_spill]] }
0x1273   : > { %p28_p3 = scmp.ge.s32.totalorder %s31_s19, 4   ;;  %s3493_s0 = sld [smem:[#allocation7_spill]] }
0x1274   : > { %s3494_s27 = smov %s2899_s28  ;;  %s3495_s28 = smov %s2903_s29 }
0x1275   : > { %s3496_s29 = smov %s3068_s25  ;;  %30 = sbr.rel (!%p28_p3) target bundleno = 10 (0xa), region = 151 }
0x127a   :  { %2277 = vsyncpa [#allocation3], 1 }
0x127b   :  { %2279 = vsyncpa [#allocation3 + $0x1], 1 }

</bundles_post_ra>
